<compile_context>
chip_gen: v7x
topology: tpu7x:2x2x1
jax: 0.10.0
libtpu: 0.0.40
codegen_flags: <defaults>
</compile_context>

<pallas_src>
import numpy as np
import jax
import jax.numpy as jnp
from jax.experimental import pallas as pl
from jax.experimental.pallas import tpu as pltpu


def _round_up(x, m):
    return (x + m - 1) // m * m


# ----------------------------- Pallas kernel ------------------------------- #

def _lstm_chunk_kernel(nvalid_ref,            # SMEM (T_pad,) int32: active batch per natural timestep
                       x_ref,                 # (Tc*Bp, Dp)    input chunk, flat time-major (shared by both dirs)
                       wx_ref,                # (1, Dp, 4*Hp)  input->gates weights, direction-indexed
                       wh_ref,                # (1, Hp, 4*Hp)  hidden->gates weights
                       b_ref,                 # (1, 1, 4*Hp)   fused bias (b_ih + b_hh)
                       h0_ref, c0_ref,        # (1, Bp, Hp)    initial state
                       out_ref,               # (1, Tc*Bp, Hp) per-step hidden (flat padded layout)
                       hN_ref, cN_ref,        # (1, Bp, Hp)    final hidden / cell
                       h_scr, c_scr,          # VMEM (Bp, Hp)  f32, carried across chunks
                       gx_scr):               # VMEM (Tc*Bp, 4*Hp) f32, per-chunk input projection
    d = pl.program_id(0)                      # direction (parallel axis)
    c = pl.program_id(1)                      # time-chunk (arbitrary / sequential axis)
    num_chunks = pl.num_programs(1)
    Bp, Hp = h_scr.shape
    Tc = x_ref.shape[0] // Bp

    @pl.when(c == 0)
    def _():
        h_scr[...] = h0_ref[0]
        c_scr[...] = c0_ref[0]

    # Non-recurrent input projection for the whole chunk: ONE big MXU call,
    # bias folded in here (once per chunk, not once per step).
    gx_scr[...] = jnp.dot(x_ref[...], wx_ref[0],
                          preferred_element_type=jnp.float32) + b_ref[0]

    wh = wh_ref[0]                             # (Hp, 4*Hp) — loop invariant
    # hoisted: iota is not CSE'd across steps, build it once per grid step
    row_ids = jax.lax.broadcasted_iota(jnp.int32, (Bp, Hp), 0)
    is_fwd = d == 0
    # natural-time index of the first timestep of this chunk
    cc = (1 - d) * c + d * (num_chunks - 1 - c)
    t_base = cc * Tc

    def step(i, carry):
        h, cs = carry
        # process the chunk in natural order for fwd, reversed for bwd
        t = jnp.where(is_fwd, i, Tc - 1 - i)
        off = pl.multiple_of(t * Bp, Bp)                      # whole-sublane-tile offset
        # recurrent part only: small (Bp, Hp) @ (Hp, 4*Hp) matmul per step
        gates = gx_scr[pl.ds(off, Bp), :] + jnp.dot(
            h, wh, preferred_element_type=jnp.float32)        # (Bp, 4*Hp)
        i_g = jax.nn.sigmoid(gates[:, 0 * Hp:1 * Hp])
        f_g = jax.nn.sigmoid(gates[:, 1 * Hp:2 * Hp])
        g_g = jnp.tanh(gates[:, 2 * Hp:3 * Hp])
        o_g = jax.nn.sigmoid(gates[:, 3 * Hp:4 * Hp])
        c_new = f_g * cs + i_g * g_g
        h_new = o_g * jnp.tanh(c_new)
        # packed-sequence semantics: only the first nvalid(t) rows are active now;
        # inactive rows carry their previous (h, c).
        n = nvalid_ref[t_base + t]
        mask = row_ids < n
        h_upd = jnp.where(mask, h_new, h)
        c_upd = jnp.where(mask, c_new, cs)
        out_ref[0, pl.ds(off, Bp), :] = h_upd                 # lane-dense (Hp=128k) store
        return (h_upd, c_upd)

    h_fin, c_fin = jax.lax.fori_loop(0, Tc, step, (h_scr[...], c_scr[...]),
                                     unroll=True)
    h_scr[...] = h_fin
    c_scr[...] = c_fin

    @pl.when(c == num_chunks - 1)
    def _():
        hN_ref[0] = h_fin
        cN_ref[0] = c_fin


# ------------------------------ glue (JAX) --------------------------------- #

def pack_lstm_weights(w_ih, w_hh, b_ih, b_hh, Dp, Hp):
    """Transpose + lane-pad torch-style LSTMCell weights.

    w_ih: (4H, D), w_hh: (4H, H), biases (4H,), gate order (i, f, g, o).
    Produces Wx: (Dp, 4*Hp), Wh: (Hp, 4*Hp), b: (1, 4*Hp) such that
        (x @ Wx + h @ Wh + b)[:, g*Hp : g*Hp+H]
            == x @ w_ih[g].T + h @ w_hh[g].T + b_ih[g] + b_hh[g]
    Padded gate columns are zero => padded H lanes of c/h stay exactly 0.
    """
    w_ih = np.asarray(w_ih, np.float32)
    w_hh = np.asarray(w_hh, np.float32)
    bsum = np.asarray(b_ih, np.float32) + np.asarray(b_hh, np.float32)
    fourH, D = w_ih.shape
    H = fourH // 4
    Wx = np.zeros((Dp, 4 * Hp), np.float32)
    Wh = np.zeros((Hp, 4 * Hp), np.float32)
    b = np.zeros((1, 4 * Hp), np.float32)
    for g in range(4):
        Wx[:D, g * Hp:g * Hp + H] = w_ih[g * H:(g + 1) * H, :].T
        Wh[:H, g * Hp:g * Hp + H] = w_hh[g * H:(g + 1) * H, :].T
        b[0, g * Hp:g * Hp + H] = bsum[g * H:(g + 1) * H]
    return jnp.asarray(Wx), jnp.asarray(Wh), jnp.asarray(b)


def rnn_layer_forward(Wx_stack, Wh_stack, b_stack, x_packed, hidden,
                      batch_size_per_step, hidden_per_dir, *, time_chunk=16):
    """Equivalent of RNNLayer.forward (cell_type='lstm', fwd [+ bwd] directions)."""
    h0, c0 = hidden
    num_dir = Wx_stack.shape[0]
    H = hidden_per_dir
    Hp = b_stack.shape[-1] // 4
    Dp = Wx_stack.shape[1]
    D = x_packed.shape[-1]
    bsps = [int(v) for v in batch_size_per_step]
    B, T = bsps[0], len(bsps)

    Bp = _round_up(B, 8)                        # f32 sublane multiple
    Tc = min(time_chunk, T)
    T_pad = _round_up(T, Tc)
    num_chunks = T_pad // Tc

    # --- packed -> padded: one scatter (no per-timestep dynamic slices) ---
    t_idx = np.concatenate([np.full(n, t, np.int32) for t, n in enumerate(bsps)])
    b_idx = np.concatenate([np.arange(n, dtype=np.int32) for n in bsps])
    flat_dst = jnp.asarray(t_idx * Bp + b_idx)                        # (N_packed,)
    x_cols = jnp.zeros((x_packed.shape[0], Dp), jnp.float32).at[:, :D].set(x_packed)
    x_padded = jnp.zeros((T_pad * Bp, Dp), jnp.float32).at[flat_dst].set(x_cols)

    nvalid_np = np.zeros((T_pad,), np.int32)
    nvalid_np[:T] = np.asarray(bsps, np.int32)
    nvalid = jnp.asarray(nvalid_np)

    h0_p = jnp.zeros((Bp, Hp), jnp.float32).at[:B, :H].set(h0)
    c0_p = jnp.zeros((Bp, Hp), jnp.float32).at[:B, :H].set(c0)
    h0_stack = jnp.stack([h0_p] * num_dir)
    c0_stack = jnp.stack([c0_p] * num_dir)

    # chunk order (and in-kernel step order) is reversed for the bwd direction
    def nat_chunk(d, c):
        return (1 - d) * c + d * (num_chunks - 1 - c)

    def x_map(d, c, nv):
        return (nat_chunk(d, c), 0)

    def out_map(d, c, nv):
        return (d, nat_chunk(d, c), 0)

    def dir_map3(d, c, nv):
        return (d, 0, 0)

    grid_spec = pltpu.PrefetchScalarGridSpec(
        num_scalar_prefetch=1,
        grid=(num_dir, num_chunks),
        in_specs=[
            pl.BlockSpec((Tc * Bp, Dp), x_map),             # x chunk, shared by both dirs
            pl.BlockSpec((1, Dp, 4 * Hp), dir_map3),        # Wx
            pl.BlockSpec((1, Hp, 4 * Hp), dir_map3),        # Wh
            pl.BlockSpec((1, 1, 4 * Hp), dir_map3),         # bias
            pl.BlockSpec((1, Bp, Hp), dir_map3),            # h0
            pl.BlockSpec((1, Bp, Hp), dir_map3),            # c0
        ],
        out_specs=[
            pl.BlockSpec((1, Tc * Bp, Hp), out_map),        # per-step hidden (flat padded)
            pl.BlockSpec((1, Bp, Hp), dir_map3),            # final h
            pl.BlockSpec((1, Bp, Hp), dir_map3),            # final c
        ],
        scratch_shapes=[pltpu.VMEM((Bp, Hp), jnp.float32),
                        pltpu.VMEM((Bp, Hp), jnp.float32),
                        pltpu.VMEM((Tc * Bp, 4 * Hp), jnp.float32)],
    )

    out_padded, hN, cN = pl.pallas_call(
        _lstm_chunk_kernel,
        grid_spec=grid_spec,
        out_shape=(jax.ShapeDtypeStruct((num_dir, T_pad * Bp, Hp), jnp.float32),
                   jax.ShapeDtypeStruct((num_dir, Bp, Hp), jnp.float32),
                   jax.ShapeDtypeStruct((num_dir, Bp, Hp), jnp.float32)),
        compiler_params=pltpu.CompilerParams(
            dimension_semantics=("parallel", "arbitrary"),
            vmem_limit_bytes=32 * 1024 * 1024),
    )(nvalid, x_padded, Wx_stack, Wh_stack, b_stack, h0_stack, c0_stack)

    # --- padded -> packed: one gather per direction ---
    dir_outputs = [jnp.take(out_padded[dd], flat_dst, axis=0)[:, :H]
                   for dd in range(num_dir)]
    output = jnp.concatenate(dir_outputs, axis=-1) if num_dir > 1 else dir_outputs[0]

    h_list = [hN[dd, :B, :H] for dd in range(num_dir)]
    c_list = [cN[dd, :B, :H] for dd in range(num_dir)]
    next_hidden = (jnp.concatenate(h_list, axis=-1) if num_dir > 1 else h_list[0],
                   jnp.concatenate(c_list, axis=-1) if num_dir > 1 else c_list[0])
    return next_hidden, output


# -------------------- numpy reference (port of torch code) ----------------- #

def _sigmoid(x):
    return 1.0 / (1.0 + np.exp(-x))


def _ref_lstm_cell(x, hc, w_ih, w_hh, b_ih, b_hh):
    h, c = hc
    gates = x @ w_ih.T + b_ih + h @ w_hh.T + b_hh
    i, f, g, o = np.split(gates, 4, axis=-1)
    i, f, o, g = _sigmoid(i), _sigmoid(f), _sigmoid(o), np.tanh(g)
    c2 = f * c + i * g
    h2 = o * np.tanh(c2)
    return (h2, c2)


def _ref_vlr(cell_fn, x, hidden, bsps, reverse):
    starting_batch_size = bsps[-1] if reverse else bsps[0]
    output = []
    input_offset = x.shape[0] if reverse else 0
    hiddens = []
    initial_hidden = hidden
    if reverse:
        hidden = tuple(h[:bsps[-1]] for h in hidden)
    last_batch_size = starting_batch_size
    for i in range(len(bsps)):
        if reverse:
            step_batch_size = bsps[-1 - i]
            step_input = x[input_offset - step_batch_size:input_offset]
            input_offset -= step_batch_size
        else:
            step_batch_size = bsps[i]
            step_input = x[input_offset:input_offset + step_batch_size]
            input_offset += step_batch_size
        new_pads = last_batch_size - step_batch_size
        if new_pads > 0:
            hiddens.insert(0, tuple(h[-new_pads:] for h in hidden))
            hidden = tuple(h[:-new_pads] for h in hidden)
        if new_pads < 0:
            hidden = tuple(np.concatenate((h, ih[last_batch_size:step_batch_size]), 0)
                           for h, ih in zip(hidden, initial_hidden))
        last_batch_size = step_batch_size
        hidden = cell_fn(step_input, hidden)
        output.append(hidden[0])
    if not reverse:
        hiddens.insert(0, hidden)
        hidden = tuple(np.concatenate(h, 0) for h in zip(*hiddens))
    if reverse:
        output.reverse()
    output = np.concatenate(output, 0)
    return hidden, output


# ----------------------------------- main ----------------------------------- #

if __name__ == "__main__":
    key = jax.random.PRNGKey(0)
    input_size, hidden_size = 16, 32
    is_bidirectional = True
    num_directions = 2 if is_bidirectional else 1
    H = hidden_size // num_directions

    # descending batch sizes per step (standard packed-sequence convention);
    # length 7 deliberately not a multiple of the time chunk to exercise padding.
    bsps = [4, 4, 3, 3, 2, 2, 1]
    B, T, N = bsps[0], len(bsps), sum(bsps)

    keys = jax.random.split(key, 8)
    x_packed = jax.random.normal(keys[0], (N, input_size), jnp.float32)
    h0 = jax.random.normal(keys[1], (B, H), jnp.float32)
    c0 = jax.random.normal(keys[2], (B, H), jnp.float32)

    def make_cell_params(k):
        k1, k2, k3, k4 = jax.random.split(k, 4)
        w_ih = 0.1 * jax.random.normal(k1, (4 * H, input_size), jnp.float32)
        w_hh = 0.1 * jax.random.normal(k2, (4 * H, H), jnp.float32)
        b_ih = 0.1 * jax.random.normal(k3, (4 * H,), jnp.float32)
        b_hh = 0.1 * jax.random.normal(k4, (4 * H,), jnp.float32)
        return w_ih, w_hh, b_ih, b_hh

    fwd_raw = make_cell_params(keys[3])
    bwd_raw = make_cell_params(keys[4])

    Dp = _round_up(input_size, 128)     # lane-align the input / contraction dim
    Hp = _round_up(H, 128)              # lane-align gate & output width

    packed_dirs = [pack_lstm_weights(*fwd_raw, Dp, Hp)]
    if is_bidirectional:
        packed_dirs.append(pack_lstm_weights(*bwd_raw, Dp, Hp))
    Wx_stack = jnp.stack([p[0] for p in packed_dirs])      # (num_dir, Dp, 4*Hp)
    Wh_stack = jnp.stack([p[1] for p in packed_dirs])      # (num_dir, Hp, 4*Hp)
    b_stack = jnp.stack([p[2] for p in packed_dirs])       # (num_dir, 1, 4*Hp)

    (hN, cN), output = rnn_layer_forward(
        Wx_stack, Wh_stack, b_stack, x_packed, (h0, c0), bsps, H, time_chunk=4)
    jax.block_until_ready((hN, cN, output))

    # ---- correctness check against a numpy port of the PyTorch module ----
    def cell_ref_factory(raw):
        w_ih, w_hh, b_ih, b_hh = [np.asarray(a) for a in raw]
        return lambda x, hc: _ref_lstm_cell(x, hc, w_ih, w_hh, b_ih, b_hh)

    xn, h0n, c0n = np.asarray(x_packed), np.asarray(h0), np.asarray(c0)
    fwd_h, fwd_o = _ref_vlr(cell_ref_factory(fwd_raw), xn, (h0n, c0n), bsps, reverse=False)
    bwd_h, bwd_o = _ref_vlr(cell_ref_factory(bwd_raw), xn, (h0n, c0n), bsps, reverse=True)
    ref_h = np.concatenate([fwd_h[0], bwd_h[0]], -1)
    ref_c = np.concatenate([fwd_h[1], bwd_h[1]], -1)
    ref_out = np.concatenate([fwd_o, bwd_o], -1)

    np.testing.assert_allclose(np.asarray(output), ref_out, atol=1e-2, rtol=1e-2)
    np.testing.assert_allclose(np.asarray(hN), ref_h, atol=1e-2, rtol=1e-2)
    np.testing.assert_allclose(np.asarray(cN), ref_c, atol=1e-2, rtol=1e-2)

    print("KERNEL_OK")
</pallas_src>

<mosaic_0001>
module attributes {stable_mosaic.version = 11 : i64} {
  func.func @_lstm_chunk_kernel(%arg0: i32, %arg1: i32, %arg2: memref<8xi32, #tpu.memory_space<smem>>, %arg3: memref<32x128xf32, #tpu.memory_space<vmem>>, %arg4: memref<1x128x512xf32, #tpu.memory_space<vmem>>, %arg5: memref<1x128x512xf32, #tpu.memory_space<vmem>>, %arg6: memref<1x1x512xf32, #tpu.memory_space<vmem>>, %arg7: memref<1x8x128xf32, #tpu.memory_space<vmem>>, %arg8: memref<1x8x128xf32, #tpu.memory_space<vmem>>, %arg9: memref<1x32x128xf32, #tpu.memory_space<vmem>>, %arg10: memref<1x8x128xf32, #tpu.memory_space<vmem>>, %arg11: memref<1x8x128xf32, #tpu.memory_space<vmem>>, %arg12: memref<8x128xf32, #tpu.memory_space<vmem>>, %arg13: memref<8x128xf32, #tpu.memory_space<vmem>>, %arg14: memref<32x512xf32, #tpu.memory_space<vmem>>) attributes {dimension_semantics = [#tpu.dimension_semantics<parallel>, #tpu.dimension_semantics<arbitrary>], iteration_bounds = array<i64: 2, 2>, scalar_prefetch = 1 : i64, scratch_operands = 3 : i64, tpu.core_type = #tpu.core_type<tc>, window_params = [{transform_indices = @transform_0, window_bounds = array<i64: 32, 128>}, {transform_indices = @transform_1, window_bounds = array<i64: 1, 128, 512>}, {transform_indices = @transform_2, window_bounds = array<i64: 1, 128, 512>}, {transform_indices = @transform_3, window_bounds = array<i64: 1, 1, 512>}, {transform_indices = @transform_4, window_bounds = array<i64: 1, 8, 128>}, {transform_indices = @transform_5, window_bounds = array<i64: 1, 8, 128>}, {transform_indices = @transform_6, window_bounds = array<i64: 1, 32, 128>}, {transform_indices = @transform_7, window_bounds = array<i64: 1, 8, 128>}, {transform_indices = @transform_8, window_bounds = array<i64: 1, 8, 128>}]} {
    %c0_i32 = arith.constant 0 : i32
    %0 = arith.cmpi eq, %arg1, %c0_i32 : i32
    %1 = arith.extui %0 : i1 to i32
    %c0_i32_0 = arith.constant 0 : i32
    %2 = arith.cmpi ne, %1, %c0_i32_0 : i32
    scf.if %2 {
      %c0_63 = arith.constant 0 : index
      %c0_64 = arith.constant 0 : index
      %c0_65 = arith.constant 0 : index
      %205 = vector.load %arg7[%c0_63, %c0_64, %c0_65] : memref<1x8x128xf32, #tpu.memory_space<vmem>>, vector<1x8x128xf32>
      %206 = vector.shape_cast %205 : vector<1x8x128xf32> to vector<8x128xf32>
      %c0_66 = arith.constant 0 : index
      %c0_67 = arith.constant 0 : index
      %207 = vector.load %arg12[%c0_66, %c0_67] : memref<8x128xf32, #tpu.memory_space<vmem>>, vector<8x128xf32>
      tpu.vector_store %arg12[%c0_66, %c0_67], %206 {strides = array<i32>} : memref<8x128xf32, #tpu.memory_space<vmem>>, vector<8x128xf32>,
      %c0_68 = arith.constant 0 : index
      %c0_69 = arith.constant 0 : index
      %c0_70 = arith.constant 0 : index
      %208 = vector.load %arg8[%c0_68, %c0_69, %c0_70] : memref<1x8x128xf32, #tpu.memory_space<vmem>>, vector<1x8x128xf32>
      %209 = vector.shape_cast %208 : vector<1x8x128xf32> to vector<8x128xf32>
      %c0_71 = arith.constant 0 : index
      %c0_72 = arith.constant 0 : index
      %210 = vector.load %arg13[%c0_71, %c0_72] : memref<8x128xf32, #tpu.memory_space<vmem>>, vector<8x128xf32>
      tpu.vector_store %arg13[%c0_71, %c0_72], %209 {strides = array<i32>} : memref<8x128xf32, #tpu.memory_space<vmem>>, vector<8x128xf32>,
    } else {
    }
    %c0 = arith.constant 0 : index
    %c0_1 = arith.constant 0 : index
    %3 = vector.load %arg3[%c0, %c0_1] : memref<32x128xf32, #tpu.memory_space<vmem>>, vector<32x128xf32>
    %c0_2 = arith.constant 0 : index
    %c0_3 = arith.constant 0 : index
    %c0_4 = arith.constant 0 : index
    %4 = vector.load %arg4[%c0_2, %c0_3, %c0_4] : memref<1x128x512xf32, #tpu.memory_space<vmem>>, vector<1x128x512xf32>
    %5 = vector.shape_cast %4 : vector<1x128x512xf32> to vector<128x512xf32>
    %cst = arith.constant dense<0.000000e+00> : vector<32x512xf32>
    %6 = tpu.matmul %3, %5, %cst {dimension_numbers = #tpu.dot_dimension_numbers<[1], [0], [0], [1], [0, 0, 1, 1], [], []>} : vector<32x128xf32>, vector<128x512xf32>, vector<32x512xf32> -> vector<32x512xf32>
    %c0_5 = arith.constant 0 : index
    %c0_6 = arith.constant 0 : index
    %c0_7 = arith.constant 0 : index
    %7 = vector.load %arg6[%c0_5, %c0_6, %c0_7] : memref<1x1x512xf32, #tpu.memory_space<vmem>>, vector<1x1x512xf32>
    %8 = vector.shape_cast %7 : vector<1x1x512xf32> to vector<1x512xf32>
    %9 = vector.broadcast %8 : vector<1x512xf32> to vector<32x512xf32>
    %10 = arith.addf %6, %9 : vector<32x512xf32>
    %c0_8 = arith.constant 0 : index
    %c0_9 = arith.constant 0 : index
    %11 = vector.load %arg14[%c0_8, %c0_9] : memref<32x512xf32, #tpu.memory_space<vmem>>, vector<32x512xf32>
    tpu.vector_store %arg14[%c0_8, %c0_9], %10 {strides = array<i32>} : memref<32x512xf32, #tpu.memory_space<vmem>>, vector<32x512xf32>,
    %c0_10 = arith.constant 0 : index
    %c0_11 = arith.constant 0 : index
    %c0_12 = arith.constant 0 : index
    %12 = vector.load %arg5[%c0_10, %c0_11, %c0_12] : memref<1x128x512xf32, #tpu.memory_space<vmem>>, vector<1x128x512xf32>
    %13 = vector.shape_cast %12 : vector<1x128x512xf32> to vector<128x512xf32>
    %14 = tpu.iota {dimensions = array<i32: 0>} : vector<8x128xi32>
    %c0_i32_13 = arith.constant 0 : i32
    %15 = arith.cmpi eq, %arg0, %c0_i32_13 : i32
    %c1_i32 = arith.constant 1 : i32
    %16 = arith.subi %c1_i32, %arg0 : i32
    %17 = arith.muli %16, %arg1 : i32
    %c1_i32_14 = arith.constant 1 : i32
    %18 = arith.subi %c1_i32_14, %arg1 : i32
    %19 = arith.muli %arg0, %18 : i32
    %20 = arith.addi %17, %19 : i32
    %c4_i32 = arith.constant 4 : i32
    %21 = arith.muli %20, %c4_i32 : i32
    %c0_15 = arith.constant 0 : index
    %c0_16 = arith.constant 0 : index
    %22 = vector.load %arg12[%c0_15, %c0_16] : memref<8x128xf32, #tpu.memory_space<vmem>>, vector<8x128xf32>
    %c0_17 = arith.constant 0 : index
    %c0_18 = arith.constant 0 : index
    %23 = vector.load %arg13[%c0_17, %c0_18] : memref<8x128xf32, #tpu.memory_space<vmem>>, vector<8x128xf32>
    %c0_i32_19 = arith.constant 0 : i32
    %c3_i32 = arith.constant 3 : i32
    %24 = arith.subi %c3_i32, %c0_i32_19 : i32
    %25 = arith.select %15, %c0_i32_19, %24 : i32
    %c8_i32 = arith.constant 8 : i32
    %26 = arith.muli %25, %c8_i32 : i32
    %27 = tpu.assume_multiple %26, 8 : i32
    %28 = arith.index_cast %27 : i32 to index
    %c0_20 = arith.constant 0 : index
    %29 = vector.load %arg14[%28, %c0_20] : memref<32x512xf32, #tpu.memory_space<vmem>>, vector<8x512xf32>
    %cst_21 = arith.constant dense<0.000000e+00> : vector<8x512xf32>
    %30 = tpu.matmul %22, %13, %cst_21 {dimension_numbers = #tpu.dot_dimension_numbers<[1], [0], [0], [1], [0, 0, 1, 1], [], []>} : vector<8x128xf32>, vector<128x512xf32>, vector<8x512xf32> -> vector<8x512xf32>
    %31 = arith.addf %29, %30 : vector<8x512xf32>
    %32 = vector.extract_strided_slice %31 {offsets = [0, 0], sizes = [8, 128], strides = [1, 1]} : vector<8x512xf32> to vector<8x128xf32>
    %33 = arith.negf %32 : vector<8x128xf32>
    %34 = math.exp %33 : vector<8x128xf32>
    %cst_22 = arith.constant 1.000000e+00 : f32
    %35 = vector.broadcast %cst_22 : f32 to vector<8x128xf32>
    %36 = arith.addf %35, %34 : vector<8x128xf32>
    %37 = arith.divf %35, %36 : vector<8x128xf32>
    %38 = vector.extract_strided_slice %31 {offsets = [0, 128], sizes = [8, 128], strides = [1, 1]} : vector<8x512xf32> to vector<8x128xf32>
    %39 = arith.negf %38 : vector<8x128xf32>
    %40 = math.exp %39 : vector<8x128xf32>
    %cst_23 = arith.constant 1.000000e+00 : f32
    %41 = vector.broadcast %cst_23 : f32 to vector<8x128xf32>
    %42 = arith.addf %41, %40 : vector<8x128xf32>
    %43 = arith.divf %41, %42 : vector<8x128xf32>
    %44 = vector.extract_strided_slice %31 {offsets = [0, 256], sizes = [8, 128], strides = [1, 1]} : vector<8x512xf32> to vector<8x128xf32>
    %45 = math.tanh %44 : vector<8x128xf32>
    %46 = vector.extract_strided_slice %31 {offsets = [0, 384], sizes = [8, 128], strides = [1, 1]} : vector<8x512xf32> to vector<8x128xf32>
    %47 = arith.negf %46 : vector<8x128xf32>
    %48 = math.exp %47 : vector<8x128xf32>
    %cst_24 = arith.constant 1.000000e+00 : f32
    %49 = vector.broadcast %cst_24 : f32 to vector<8x128xf32>
    %50 = arith.addf %49, %48 : vector<8x128xf32>
    %51 = arith.divf %49, %50 : vector<8x128xf32>
    %52 = arith.mulf %43, %23 : vector<8x128xf32>
    %53 = arith.mulf %37, %45 : vector<8x128xf32>
    %54 = arith.addf %52, %53 : vector<8x128xf32>
    %55 = math.tanh %54 : vector<8x128xf32>
    %56 = arith.mulf %51, %55 : vector<8x128xf32>
    %57 = arith.addi %21, %25 : i32
    %58 = arith.index_cast %57 : i32 to index
    %59 = memref.load %arg2[%58] : memref<8xi32, #tpu.memory_space<smem>>
    %60 = vector.broadcast %59 : i32 to vector<8x128xi32>
    %61 = arith.cmpi slt, %14, %60 : vector<8x128xi32>
    %62 = arith.select %61, %56, %22 : vector<8x128xi1>, vector<8x128xf32>
    %63 = arith.select %61, %54, %23 : vector<8x128xi1>, vector<8x128xf32>
    %c0_25 = arith.constant 0 : index
    %64 = arith.index_cast %27 : i32 to index
    %c0_26 = arith.constant 0 : index
    %65 = vector.load %arg9[%c0_25, %64, %c0_26] : memref<1x32x128xf32, #tpu.memory_space<vmem>>, vector<1x8x128xf32>
    %66 = vector.shape_cast %65 : vector<1x8x128xf32> to vector<8x128xf32>
    %67 = vector.shape_cast %62 : vector<8x128xf32> to vector<1x8x128xf32>
    tpu.vector_store %arg9[%c0_25, %64, %c0_26], %67 {strides = array<i32>} : memref<1x32x128xf32, #tpu.memory_space<vmem>>, vector<1x8x128xf32>,
    %c1_i32_27 = arith.constant 1 : i32
    %c3_i32_28 = arith.constant 3 : i32
    %68 = arith.subi %c3_i32_28, %c1_i32_27 : i32
    %69 = arith.select %15, %c1_i32_27, %68 : i32
    %c8_i32_29 = arith.constant 8 : i32
    %70 = arith.muli %69, %c8_i32_29 : i32
    %71 = tpu.assume_multiple %70, 8 : i32
    %72 = arith.index_cast %71 : i32 to index
    %c0_30 = arith.constant 0 : index
    %73 = vector.load %arg14[%72, %c0_30] : memref<32x512xf32, #tpu.memory_space<vmem>>, vector<8x512xf32>
    %cst_31 = arith.constant dense<0.000000e+00> : vector<8x512xf32>
    %74 = tpu.matmul %62, %13, %cst_31 {dimension_numbers = #tpu.dot_dimension_numbers<[1], [0], [0], [1], [0, 0, 1, 1], [], []>} : vector<8x128xf32>, vector<128x512xf32>, vector<8x512xf32> -> vector<8x512xf32>
    %75 = arith.addf %73, %74 : vector<8x512xf32>
    %76 = vector.extract_strided_slice %75 {offsets = [0, 0], sizes = [8, 128], strides = [1, 1]} : vector<8x512xf32> to vector<8x128xf32>
    %77 = arith.negf %76 : vector<8x128xf32>
    %78 = math.exp %77 : vector<8x128xf32>
    %cst_32 = arith.constant 1.000000e+00 : f32
    %79 = vector.broadcast %cst_32 : f32 to vector<8x128xf32>
    %80 = arith.addf %79, %78 : vector<8x128xf32>
    %81 = arith.divf %79, %80 : vector<8x128xf32>
    %82 = vector.extract_strided_slice %75 {offsets = [0, 128], sizes = [8, 128], strides = [1, 1]} : vector<8x512xf32> to vector<8x128xf32>
    %83 = arith.negf %82 : vector<8x128xf32>
    %84 = math.exp %83 : vector<8x128xf32>
    %cst_33 = arith.constant 1.000000e+00 : f32
    %85 = vector.broadcast %cst_33 : f32 to vector<8x128xf32>
    %86 = arith.addf %85, %84 : vector<8x128xf32>
    %87 = arith.divf %85, %86 : vector<8x128xf32>
    %88 = vector.extract_strided_slice %75 {offsets = [0, 256], sizes = [8, 128], strides = [1, 1]} : vector<8x512xf32> to vector<8x128xf32>
    %89 = math.tanh %88 : vector<8x128xf32>
    %90 = vector.extract_strided_slice %75 {offsets = [0, 384], sizes = [8, 128], strides = [1, 1]} : vector<8x512xf32> to vector<8x128xf32>
    %91 = arith.negf %90 : vector<8x128xf32>
    %92 = math.exp %91 : vector<8x128xf32>
    %cst_34 = arith.constant 1.000000e+00 : f32
    %93 = vector.broadcast %cst_34 : f32 to vector<8x128xf32>
    %94 = arith.addf %93, %92 : vector<8x128xf32>
    %95 = arith.divf %93, %94 : vector<8x128xf32>
    %96 = arith.mulf %87, %63 : vector<8x128xf32>
    %97 = arith.mulf %81, %89 : vector<8x128xf32>
    %98 = arith.addf %96, %97 : vector<8x128xf32>
    %99 = math.tanh %98 : vector<8x128xf32>
    %100 = arith.mulf %95, %99 : vector<8x128xf32>
    %101 = arith.addi %21, %69 : i32
    %102 = arith.index_cast %101 : i32 to index
    %103 = memref.load %arg2[%102] : memref<8xi32, #tpu.memory_space<smem>>
    %104 = vector.broadcast %103 : i32 to vector<8x128xi32>
    %105 = arith.cmpi slt, %14, %104 : vector<8x128xi32>
    %106 = arith.select %105, %100, %62 : vector<8x128xi1>, vector<8x128xf32>
    %107 = arith.select %105, %98, %63 : vector<8x128xi1>, vector<8x128xf32>
    %c0_35 = arith.constant 0 : index
    %108 = arith.index_cast %71 : i32 to index
    %c0_36 = arith.constant 0 : index
    %109 = vector.load %arg9[%c0_35, %108, %c0_36] : memref<1x32x128xf32, #tpu.memory_space<vmem>>, vector<1x8x128xf32>
    %110 = vector.shape_cast %109 : vector<1x8x128xf32> to vector<8x128xf32>
    %111 = vector.shape_cast %106 : vector<8x128xf32> to vector<1x8x128xf32>
    tpu.vector_store %arg9[%c0_35, %108, %c0_36], %111 {strides = array<i32>} : memref<1x32x128xf32, #tpu.memory_space<vmem>>, vector<1x8x128xf32>,
    %c2_i32 = arith.constant 2 : i32
    %c3_i32_37 = arith.constant 3 : i32
    %112 = arith.subi %c3_i32_37, %c2_i32 : i32
    %113 = arith.select %15, %c2_i32, %112 : i32
    %c8_i32_38 = arith.constant 8 : i32
    %114 = arith.muli %113, %c8_i32_38 : i32
    %115 = tpu.assume_multiple %114, 8 : i32
    %116 = arith.index_cast %115 : i32 to index
    %c0_39 = arith.constant 0 : index
    %117 = vector.load %arg14[%116, %c0_39] : memref<32x512xf32, #tpu.memory_space<vmem>>, vector<8x512xf32>
    %cst_40 = arith.constant dense<0.000000e+00> : vector<8x512xf32>
    %118 = tpu.matmul %106, %13, %cst_40 {dimension_numbers = #tpu.dot_dimension_numbers<[1], [0], [0], [1], [0, 0, 1, 1], [], []>} : vector<8x128xf32>, vector<128x512xf32>, vector<8x512xf32> -> vector<8x512xf32>
    %119 = arith.addf %117, %118 : vector<8x512xf32>
    %120 = vector.extract_strided_slice %119 {offsets = [0, 0], sizes = [8, 128], strides = [1, 1]} : vector<8x512xf32> to vector<8x128xf32>
    %121 = arith.negf %120 : vector<8x128xf32>
    %122 = math.exp %121 : vector<8x128xf32>
    %cst_41 = arith.constant 1.000000e+00 : f32
    %123 = vector.broadcast %cst_41 : f32 to vector<8x128xf32>
    %124 = arith.addf %123, %122 : vector<8x128xf32>
    %125 = arith.divf %123, %124 : vector<8x128xf32>
    %126 = vector.extract_strided_slice %119 {offsets = [0, 128], sizes = [8, 128], strides = [1, 1]} : vector<8x512xf32> to vector<8x128xf32>
    %127 = arith.negf %126 : vector<8x128xf32>
    %128 = math.exp %127 : vector<8x128xf32>
    %cst_42 = arith.constant 1.000000e+00 : f32
    %129 = vector.broadcast %cst_42 : f32 to vector<8x128xf32>
    %130 = arith.addf %129, %128 : vector<8x128xf32>
    %131 = arith.divf %129, %130 : vector<8x128xf32>
    %132 = vector.extract_strided_slice %119 {offsets = [0, 256], sizes = [8, 128], strides = [1, 1]} : vector<8x512xf32> to vector<8x128xf32>
    %133 = math.tanh %132 : vector<8x128xf32>
    %134 = vector.extract_strided_slice %119 {offsets = [0, 384], sizes = [8, 128], strides = [1, 1]} : vector<8x512xf32> to vector<8x128xf32>
    %135 = arith.negf %134 : vector<8x128xf32>
    %136 = math.exp %135 : vector<8x128xf32>
    %cst_43 = arith.constant 1.000000e+00 : f32
    %137 = vector.broadcast %cst_43 : f32 to vector<8x128xf32>
    %138 = arith.addf %137, %136 : vector<8x128xf32>
    %139 = arith.divf %137, %138 : vector<8x128xf32>
    %140 = arith.mulf %131, %107 : vector<8x128xf32>
    %141 = arith.mulf %125, %133 : vector<8x128xf32>
    %142 = arith.addf %140, %141 : vector<8x128xf32>
    %143 = math.tanh %142 : vector<8x128xf32>
    %144 = arith.mulf %139, %143 : vector<8x128xf32>
    %145 = arith.addi %21, %113 : i32
    %146 = arith.index_cast %145 : i32 to index
    %147 = memref.load %arg2[%146] : memref<8xi32, #tpu.memory_space<smem>>
    %148 = vector.broadcast %147 : i32 to vector<8x128xi32>
    %149 = arith.cmpi slt, %14, %148 : vector<8x128xi32>
    %150 = arith.select %149, %144, %106 : vector<8x128xi1>, vector<8x128xf32>
    %151 = arith.select %149, %142, %107 : vector<8x128xi1>, vector<8x128xf32>
    %c0_44 = arith.constant 0 : index
    %152 = arith.index_cast %115 : i32 to index
    %c0_45 = arith.constant 0 : index
    %153 = vector.load %arg9[%c0_44, %152, %c0_45] : memref<1x32x128xf32, #tpu.memory_space<vmem>>, vector<1x8x128xf32>
    %154 = vector.shape_cast %153 : vector<1x8x128xf32> to vector<8x128xf32>
    %155 = vector.shape_cast %150 : vector<8x128xf32> to vector<1x8x128xf32>
    tpu.vector_store %arg9[%c0_44, %152, %c0_45], %155 {strides = array<i32>} : memref<1x32x128xf32, #tpu.memory_space<vmem>>, vector<1x8x128xf32>,
    %c3_i32_46 = arith.constant 3 : i32
    %c3_i32_47 = arith.constant 3 : i32
    %156 = arith.subi %c3_i32_47, %c3_i32_46 : i32
    %157 = arith.select %15, %c3_i32_46, %156 : i32
    %c8_i32_48 = arith.constant 8 : i32
    %158 = arith.muli %157, %c8_i32_48 : i32
    %159 = tpu.assume_multiple %158, 8 : i32
    %160 = arith.index_cast %159 : i32 to index
    %c0_49 = arith.constant 0 : index
    %161 = vector.load %arg14[%160, %c0_49] : memref<32x512xf32, #tpu.memory_space<vmem>>, vector<8x512xf32>
    %cst_50 = arith.constant dense<0.000000e+00> : vector<8x512xf32>
    %162 = tpu.matmul %150, %13, %cst_50 {dimension_numbers = #tpu.dot_dimension_numbers<[1], [0], [0], [1], [0, 0, 1, 1], [], []>} : vector<8x128xf32>, vector<128x512xf32>, vector<8x512xf32> -> vector<8x512xf32>
    %163 = arith.addf %161, %162 : vector<8x512xf32>
    %164 = vector.extract_strided_slice %163 {offsets = [0, 0], sizes = [8, 128], strides = [1, 1]} : vector<8x512xf32> to vector<8x128xf32>
    %165 = arith.negf %164 : vector<8x128xf32>
    %166 = math.exp %165 : vector<8x128xf32>
    %cst_51 = arith.constant 1.000000e+00 : f32
    %167 = vector.broadcast %cst_51 : f32 to vector<8x128xf32>
    %168 = arith.addf %167, %166 : vector<8x128xf32>
    %169 = arith.divf %167, %168 : vector<8x128xf32>
    %170 = vector.extract_strided_slice %163 {offsets = [0, 128], sizes = [8, 128], strides = [1, 1]} : vector<8x512xf32> to vector<8x128xf32>
    %171 = arith.negf %170 : vector<8x128xf32>
    %172 = math.exp %171 : vector<8x128xf32>
    %cst_52 = arith.constant 1.000000e+00 : f32
    %173 = vector.broadcast %cst_52 : f32 to vector<8x128xf32>
    %174 = arith.addf %173, %172 : vector<8x128xf32>
    %175 = arith.divf %173, %174 : vector<8x128xf32>
    %176 = vector.extract_strided_slice %163 {offsets = [0, 256], sizes = [8, 128], strides = [1, 1]} : vector<8x512xf32> to vector<8x128xf32>
    %177 = math.tanh %176 : vector<8x128xf32>
    %178 = vector.extract_strided_slice %163 {offsets = [0, 384], sizes = [8, 128], strides = [1, 1]} : vector<8x512xf32> to vector<8x128xf32>
    %179 = arith.negf %178 : vector<8x128xf32>
    %180 = math.exp %179 : vector<8x128xf32>
    %cst_53 = arith.constant 1.000000e+00 : f32
    %181 = vector.broadcast %cst_53 : f32 to vector<8x128xf32>
    %182 = arith.addf %181, %180 : vector<8x128xf32>
    %183 = arith.divf %181, %182 : vector<8x128xf32>
    %184 = arith.mulf %175, %151 : vector<8x128xf32>
    %185 = arith.mulf %169, %177 : vector<8x128xf32>
    %186 = arith.addf %184, %185 : vector<8x128xf32>
    %187 = math.tanh %186 : vector<8x128xf32>
    %188 = arith.mulf %183, %187 : vector<8x128xf32>
    %189 = arith.addi %21, %157 : i32
    %190 = arith.index_cast %189 : i32 to index
    %191 = memref.load %arg2[%190] : memref<8xi32, #tpu.memory_space<smem>>
    %192 = vector.broadcast %191 : i32 to vector<8x128xi32>
    %193 = arith.cmpi slt, %14, %192 : vector<8x128xi32>
    %194 = arith.select %193, %188, %150 : vector<8x128xi1>, vector<8x128xf32>
    %195 = arith.select %193, %186, %151 : vector<8x128xi1>, vector<8x128xf32>
    %c0_54 = arith.constant 0 : index
    %196 = arith.index_cast %159 : i32 to index
    %c0_55 = arith.constant 0 : index
    %197 = vector.load %arg9[%c0_54, %196, %c0_55] : memref<1x32x128xf32, #tpu.memory_space<vmem>>, vector<1x8x128xf32>
    %198 = vector.shape_cast %197 : vector<1x8x128xf32> to vector<8x128xf32>
    %199 = vector.shape_cast %194 : vector<8x128xf32> to vector<1x8x128xf32>
    tpu.vector_store %arg9[%c0_54, %196, %c0_55], %199 {strides = array<i32>} : memref<1x32x128xf32, #tpu.memory_space<vmem>>, vector<1x8x128xf32>,
    %c4_i32_56 = arith.constant 4 : i32
    %c0_57 = arith.constant 0 : index
    %c0_58 = arith.constant 0 : index
    %200 = vector.load %arg12[%c0_57, %c0_58] : memref<8x128xf32, #tpu.memory_space<vmem>>, vector<8x128xf32>
    tpu.vector_store %arg12[%c0_57, %c0_58], %194 {strides = array<i32>} : memref<8x128xf32, #tpu.memory_space<vmem>>, vector<8x128xf32>,
    %c0_59 = arith.constant 0 : index
    %c0_60 = arith.constant 0 : index
    %201 = vector.load %arg13[%c0_59, %c0_60] : memref<8x128xf32, #tpu.memory_space<vmem>>, vector<8x128xf32>
    tpu.vector_store %arg13[%c0_59, %c0_60], %195 {strides = array<i32>} : memref<8x128xf32, #tpu.memory_space<vmem>>, vector<8x128xf32>,
    %c1_i32_61 = arith.constant 1 : i32
    %202 = arith.cmpi eq, %arg1, %c1_i32_61 : i32
    %203 = arith.extui %202 : i1 to i32
    %c0_i32_62 = arith.constant 0 : i32
    %204 = arith.cmpi ne, %203, %c0_i32_62 : i32
    scf.if %204 {
      %c0_63 = arith.constant 0 : index
      %c0_64 = arith.constant 0 : index
      %c0_65 = arith.constant 0 : index
      %205 = vector.load %arg10[%c0_63, %c0_64, %c0_65] : memref<1x8x128xf32, #tpu.memory_space<vmem>>, vector<1x8x128xf32>
      %206 = vector.shape_cast %205 : vector<1x8x128xf32> to vector<8x128xf32>
      %207 = vector.shape_cast %194 : vector<8x128xf32> to vector<1x8x128xf32>
      tpu.vector_store %arg10[%c0_63, %c0_64, %c0_65], %207 {strides = array<i32>} : memref<1x8x128xf32, #tpu.memory_space<vmem>>, vector<1x8x128xf32>,
      %c0_66 = arith.constant 0 : index
      %c0_67 = arith.constant 0 : index
      %c0_68 = arith.constant 0 : index
      %208 = vector.load %arg11[%c0_66, %c0_67, %c0_68] : memref<1x8x128xf32, #tpu.memory_space<vmem>>, vector<1x8x128xf32>
      %209 = vector.shape_cast %208 : vector<1x8x128xf32> to vector<8x128xf32>
      %210 = vector.shape_cast %195 : vector<8x128xf32> to vector<1x8x128xf32>
      tpu.vector_store %arg11[%c0_66, %c0_67, %c0_68], %210 {strides = array<i32>} : memref<1x8x128xf32, #tpu.memory_space<vmem>>, vector<1x8x128xf32>,
    } else {
    }
    return
  }
  func.func @transform_0(%arg0: i32, %arg1: i32, %arg2: memref<8xi32, #tpu.memory_space<smem>>) -> (i32, i32) {
    %c1_i32 = arith.constant 1 : i32
    %0 = arith.subi %c1_i32, %arg0 : i32
    %1 = arith.muli %0, %arg1 : i32
    %c1_i32_0 = arith.constant 1 : i32
    %2 = arith.subi %c1_i32_0, %arg1 : i32
    %3 = arith.muli %arg0, %2 : i32
    %4 = arith.addi %1, %3 : i32
    %c0_i32 = arith.constant 0 : i32
    %c0_i32_1 = arith.constant 0 : i32
    return %4, %c0_i32 : i32, i32
  }
  func.func @transform_1(%arg0: i32, %arg1: i32, %arg2: memref<8xi32, #tpu.memory_space<smem>>) -> (i32, i32, i32) {
    %c0_i32 = arith.constant 0 : i32
    %c0_i32_0 = arith.constant 0 : i32
    %c0_i32_1 = arith.constant 0 : i32
    return %arg0, %c0_i32, %c0_i32_0 : i32, i32, i32
  }
  func.func @transform_2(%arg0: i32, %arg1: i32, %arg2: memref<8xi32, #tpu.memory_space<smem>>) -> (i32, i32, i32) {
    %c0_i32 = arith.constant 0 : i32
    %c0_i32_0 = arith.constant 0 : i32
    %c0_i32_1 = arith.constant 0 : i32
    return %arg0, %c0_i32, %c0_i32_0 : i32, i32, i32
  }
  func.func @transform_3(%arg0: i32, %arg1: i32, %arg2: memref<8xi32, #tpu.memory_space<smem>>) -> (i32, i32, i32) {
    %c0_i32 = arith.constant 0 : i32
    %c0_i32_0 = arith.constant 0 : i32
    %c0_i32_1 = arith.constant 0 : i32
    return %arg0, %c0_i32, %c0_i32_0 : i32, i32, i32
  }
  func.func @transform_4(%arg0: i32, %arg1: i32, %arg2: memref<8xi32, #tpu.memory_space<smem>>) -> (i32, i32, i32) {
    %c0_i32 = arith.constant 0 : i32
    %c0_i32_0 = arith.constant 0 : i32
    %c0_i32_1 = arith.constant 0 : i32
    return %arg0, %c0_i32, %c0_i32_0 : i32, i32, i32
  }
  func.func @transform_5(%arg0: i32, %arg1: i32, %arg2: memref<8xi32, #tpu.memory_space<smem>>) -> (i32, i32, i32) {
    %c0_i32 = arith.constant 0 : i32
    %c0_i32_0 = arith.constant 0 : i32
    %c0_i32_1 = arith.constant 0 : i32
    return %arg0, %c0_i32, %c0_i32_0 : i32, i32, i32
  }
  func.func @transform_6(%arg0: i32, %arg1: i32, %arg2: memref<8xi32, #tpu.memory_space<smem>>) -> (i32, i32, i32) {
    %c1_i32 = arith.constant 1 : i32
    %0 = arith.subi %c1_i32, %arg0 : i32
    %1 = arith.muli %0, %arg1 : i32
    %c1_i32_0 = arith.constant 1 : i32
    %2 = arith.subi %c1_i32_0, %arg1 : i32
    %3 = arith.muli %arg0, %2 : i32
    %4 = arith.addi %1, %3 : i32
    %c0_i32 = arith.constant 0 : i32
    %c0_i32_1 = arith.constant 0 : i32
    return %arg0, %4, %c0_i32 : i32, i32, i32
  }
  func.func @transform_7(%arg0: i32, %arg1: i32, %arg2: memref<8xi32, #tpu.memory_space<smem>>) -> (i32, i32, i32) {
    %c0_i32 = arith.constant 0 : i32
    %c0_i32_0 = arith.constant 0 : i32
    %c0_i32_1 = arith.constant 0 : i32
    return %arg0, %c0_i32, %c0_i32_0 : i32, i32, i32
  }
  func.func @transform_8(%arg0: i32, %arg1: i32, %arg2: memref<8xi32, #tpu.memory_space<smem>>) -> (i32, i32, i32) {
    %c0_i32 = arith.constant 0 : i32
    %c0_i32_0 = arith.constant 0 : i32
    %c0_i32_1 = arith.constant 0 : i32
    return %arg0, %c0_i32, %c0_i32_0 : i32, i32, i32
  }
}

</mosaic_0001>

<bundles_post_ra>
// kernel: tpu_custom_call.1
= control target key start
LH: loop header
LB: loop body
LE: loop exit
PB: predicated region body
PF: predicated region fallthrough
CT: control target
= control target key end

     0   :  { %s4099_s0 = inlined_call_operand.hbm [shape: s32[8], index: 0, kind: input, shape index: {}]   ;;  %s4100_s1 = inlined_call_operand.hbm [shape: f32[64,128], index: 1, kind: input, shape index: {}]   ;;  %s4101_s2 = inlined_call_operand.hbm [shape: f32[2,128,512], index: 2, kind: input, shape index: {}]   ;;  %s4102_s3 = inlined_call_operand.hbm [shape: f32[2,128,512], index: 3, kind: input, shape index: {}]   ;;  %s4103_s4 = inlined_call_operand.hbm [shape: f32[2,1,512], index: 4, kind: input, shape index: {}]   ;;  %s4104_s5 = inlined_call_operand.vmem [shape: f32[2,8,128], index: 5, kind: input, shape index: {}]   ;;  %s4105_s6 = inlined_call_operand.hbm [shape: f32[2,8,128], index: 6, kind: input, shape index: {}]   ;;  %s4106_s7 = inlined_call_operand.hbm [shape: f32[2,64,128], index: 7, kind: output, shape index: {0}]   ;;  %s4107_s8 = inlined_call_operand.hbm [shape: f32[2,8,128], index: 8, kind: output, shape index: {1}]   ;;  %s4108_s9 = inlined_call_operand.hbm [shape: f32[2,8,128], index: 9, kind: output, shape index: {2}]  }
   0x1   :  { %4154 = sst [smem:[#allocation42_spill]] %s4100_s1  ;;  %s2637_s11 = scalar_lea.hbm %s4099_s0, 16 }
   0x2   :  { %4155 = sst [smem:[#allocation43_spill]] %s4101_s2  ;;  %p2638_p0 = scmp.ne.s32.totalorder %s4099_s0, %s2637_s11 }
   0x3   :  { %4156 = sst [smem:[#allocation44_spill]] %s4102_s3  ;;  %p2641_p1 = scmp.lt.u32.totalorder %s2637_s11, %s4099_s0 }
   0x4   :  { %4157 = sst [smem:[#allocation45_spill]] %s4103_s4 }
   0x5   :  { %4158 = sst [smem:[#allocation46_spill]] %s4104_s5  ;;  %p2643_p2 = pnand %p2641_p1, %p2638_p0 }
   0x6   :  { %4159 = sst [smem:[#allocation47_spill]] %s4105_s6 }
   0x7   :  { %4160 = sst [smem:[#allocation48_spill]] %s4106_s7 }
   0x8   :  { %4161 = sst [smem:[#allocation49_spill]] %s4107_s8 }
   0x9   :  { %4162 = sst [smem:[#allocation50_spill]] %s4108_s9 }
   0xa   :  { %2646 = shalt.err (!%p2643_p2)  }
   0xb   :  { %s3015_s16 = smov [#allocation6]  }
   0xc   :  { %16 = dma.hbm_to_smem %s4099_s0, 16, %s3015_s16, [#allocation5] }
   0xd   :  { %2937 = dma.done.wait [#allocation5], 16 }
   0xe   :  { %2938 = vsyncadd [#allocation5], 4294967280 }
   0xf   :  { %18 = sfence }
  0x10   :  { %19 = vsyncpa [#allocation8], 0 }
  0x11   :  { %21 = vsyncpa [#allocation8 + $0x1], 0 }
  0x12   :  { %22 = vsyncpa [#allocation11], 0 }
  0x13   :  { %24 = vsyncpa [#allocation11 + $0x1], 0 }
  0x14   :  { %25 = vsyncpa [#allocation14], 0 }
  0x15   :  { %27 = vsyncpa [#allocation14 + $0x1], 0 }
  0x16   :  { %28 = vsyncpa [#allocation9], 0 }
  0x17   :  { %30 = vsyncpa [#allocation9 + $0x1], 0 }
  0x18   :  { %31 = vsyncpa [#allocation18], 0 }
  0x19   :  { %33 = vsyncpa [#allocation18 + $0x1], 0  ;;  %s3093_s19 = smov 0   ;;  %s3095_s20 = smov 0  }
  0x1a   :  { %s3097_s21 = smov 0   ;;  %s3099_s0 = smov 0  }
  0x1b   :  { %s3101_s22 = smov 0   ;;  %s3103_s23 = smov 0  }
  0x1c   :  { %s3105_s24 = smov 0   ;;  %s3107_s25 = smov 0  }
  0x1d   :  { %s3109_s26 = smov 0   ;;  %s3111_s27 = smov 0  }
  0x1e   :  { %s3113_s28 = smov 0   ;;  %s3115_s29 = smov 0  }
  0x1f   :  { %s3117_s30 = smov 0   ;;  %s3119_s10 = smov 0  }
  0x20 LB: > { %4163 = sst [smem:[#allocation26_spill]] %s2961_s19  ;;  %s3164_s11 = sadd.s32 4294967295, %s3013_s10   ;;  %s3013_s10 = sphi %s3119_s10, %s39_s10   ;;  %s3009_s30 = sphi %s3117_s30, %s4260_s30   ;;  %s3005_s29 = sphi %s3115_s29, %s4248_s29   ;;  %s3001_s28 = sphi %s3113_s28, %s4259_s28   ;;  %s2997_s27 = sphi %s3111_s27, %s4258_s27   ;;  %s2993_s26 = sphi %s3109_s26, %s4246_s26   ;;  %s2989_s25 = sphi %s3107_s25, %s4257_s25   ;;  %s2985_s24 = sphi %s3105_s24, %s4256_s24   ;;  %s2981_s23 = sphi %s3103_s23, %s4255_s23   ;;  %s2977_s22 = sphi %s3101_s22, %s4254_s22   ;;  %s2973_s0 = sphi %s3099_s0, %s4253_s0   ;;  %s2969_s21 = sphi %s3097_s21, %s4252_s21   ;;  %s2965_s20 = sphi %s3095_s20, %s4251_s20   ;;  %s2961_s19 = sphi %s3093_s19, %s4250_s19  }
  0x21   : > { %4164 = sst [smem:[#allocation27_spill]] %s2993_s26  ;;  %s4109_s12 = sadd.s32 4294967294, %s3013_s10  }
  0x22   : > { %4165 = sst [smem:[#allocation28_spill]] %s2997_s27  ;;  %p4126_p3 = scmp.eq.s32.totalorder %s3013_s10, 0 }
  0x23   : > { %4166 = sst [smem:[#allocation29_spill]] %s3001_s28  ;;  %p101_p4 = scmp.ne.s32.totalorder %s2981_s23, %s2977_s22 }
  0x24   : > { %4167 = sst [smem:[#allocation30_spill]] %s3005_s29  ;;  %p4125_p5 = scmp.ne.s32.totalorder %s2977_s22, %s2973_s0 }
  0x25   : > { %p4124_p6 = scmp.eq.s32.totalorder %s3164_s11, 3  ;;  %p3176_p7 = scmp.eq.s32.totalorder %s4109_s12, 3 }
  0x26   : > { %p103_p8 = por %p101_p4, %p4126_p3  ;;  %p4123_p11 = scmp.lt.s32.totalorder %s3013_s10, 4 }
  0x27   : > { %s4168_s14 = scalar_select %p3176_p7, 1, 0 }
  0x28   : > { %p3184_p9 = por %p4124_p6, %p101_p4  ;;  %p3193_p10 = por %p3176_p7, %p4125_p5 }
  0x29   : > { %4169 = sst [smem:[#allocation31_spill]] %s4168_s14  ;;  %s3200_s18 = sand.u32 1, %s2981_s23  }
  0x2a   : > { %s4170_s15 = scalar_select %p3184_p9, 1, 0 }
  0x2b   : > { %s4172_s16 = scalar_select %p3193_p10, 1, 0 }
  0x2c   : > { %4171 = sst [smem:[#allocation32_spill]] %s4170_s15  ;;  %s4117_s12 = sshll.u32 %s3200_s18, 9 }
  0x2d   : > { %4173 = sst [smem:[#allocation33_spill]] %s4172_s16  ;;  %s4118_s13 = sshll.u32 %s3009_s30, 13 }
  0x2e   : > { %4174 = sst [smem:[#allocation34_spill]] %s3200_s18  ;;  %s4175_s2 = sld [smem:[#allocation43_spill]] }
  0x2f   : > { %s355_s16 = scalar_lea.vmem [#allocation10], %s4117_s12  ;;  %p3215_p12 = pnand %p4123_p11, %p103_p8 }
  0x30   : > { %s362_s15 = sshll.u32 %s355_s16, 4  ;;  %s4177_s27 = sand.u32 1, %s3013_s10   ;;  %s3219_s15 = int_to_ptr.vmem [resolvable:$true] %s362_s15 }
  0x31   : > { %s4176_s17 = scalar_select %p3215_p12, 1, 0 }
  0x32   : > { %s3223_s5 = scalar_lea.sflag [#allocation11], %s4177_s27  ;;  %p3229_p0 = pneg %p3215_p12 }
  0x33   : > { %4178 = sst [smem:[#allocation35_spill]] %s3223_s5 }
  0x34   : > { %s3209_s8 = scalar_lea.hbm %s4175_s2, %s4118_s13  ;;  %s2652_s13 = scalar_lea.hbm %s4175_s2, 16384 }
  0x35   : > { %s2647_s7 = scalar_lea.hbm %s3209_s8, 8192  ;;  %p2653_p4 = scmp.lt.u32.totalorder %s3209_s8, %s4175_s2 }
  0x36   : > { %p2648_p13 = scmp.ne.s32.totalorder %s3209_s8, %s2647_s7  ;;  %p2654_p8 = scmp.lt.u32.totalorder %s2652_s13, %s2647_s7 }
  0x37   : > { %p2656_p6 = scmp.lt.u32.totalorder %s2647_s7, %s3209_s8 }
  0x38   : > { %p2650_p1 = pnand %p3229_p0, %p2648_p13  ;;  %p2655_p11 = por %p2654_p8, %p2653_p4 }
  0x3a   : > { %p2651_p2 = pneg %p2650_p1  ;;  %p2657_p5 = por %p2656_p6, %p2655_p11 }
  0x3c   : > { %p2658_p3 = pnand %p2657_p5, %p2651_p2 }
  0x3e   : > { %2661 = shalt.err (!%p2658_p3)
}
  0x3f   : > { %s2662_s27 = scalar_lea.vmem %s3219_s15, 8192  ;;  %s3016_s12 = smov [#allocation10]  }
  0x40   : > { %p2663_p13 = scmp.ne.s32.totalorder %s3219_s15, %s2662_s27  ;;  %s2667_s16 = sshll.u32 %s3016_s12, 4  ;;  %s2668_s16 = int_to_ptr.vmem [resolvable:$false] %s2667_s16 }
  0x41   : > { %s2669_s6 = scalar_lea.vmem %s2668_s16, 16384  ;;  %p2670_p9 = scmp.lt.s32.totalorder %s3219_s15, %s2668_s16 }
  0x42   : > { %p2665_p1 = pnand %p2663_p13, %p3229_p0  ;;  %p2671_p7 = scmp.lt.s32.totalorder %s2669_s6, %s2662_s27 }
  0x44   : > { %p2666_p10 = pneg %p2665_p1  ;;  %p2672_p4 = por %p2671_p7, %p2670_p9 }
  0x46   : > { %p2673_p8 = pnand %p2672_p4, %p2666_p10 }
  0x48   : > { %2676 = shalt.err (!%p2673_p8)
}
  0x49   : > { %s4131_s28 = smov 512   ;;  %s4132_s13 = smov 32  }
  0x4a   : > { %2431 = dma.hbm_to_vmem [thread:$0]  (!%p3215_p12), %s3209_s8, 8192, %s3219_s15, %s3223_s5, %s4131_s28, %s4131_s28, %s4132_s13  }
  0x4b   : > { %s4180_s7 = sshll.u32 %s3009_s30, 13  ;;  %s4181_s3 = sld [smem:[#allocation44_spill]] }
  0x4c   : > { %s4182_s6 = sshll.u32 %s3200_s18, 9  ;;  %p2034_p3 = scmp.ge.s32.totalorder %s3013_s10, 1 }
  0x4d   : > { %s376_s2 = scalar_lea.vmem [#allocation12], %s4182_s6  ;;  %p435_p5 = scmp.lt.s32.totalorder %s3013_s10, 5 }
  0x4e   : > { %s383_s1 = sshll.u32 %s376_s2, 4  ;;  %s2029_s14 = sshll.u32 %s3200_s18, 2  ;;  %s3266_s1 = int_to_ptr.vmem [resolvable:$true] %s383_s1 }
  0x4f   : > { %p3270_p6 = pnand %p2034_p3, %p435_p5  ;;  %s2084_s8 = sshll.u32 %s3009_s30, 6 }
  0x50   : > { %s397_s15 = scalar_lea.vmem [#allocation13], %s2029_s14  ;;  %s4185_s4 = sld [smem:[#allocation45_spill]] }
  0x51   : > { %s3261_s16 = scalar_lea.hbm %s4181_s3, %s4180_s7  ;;  %s405_s28 = sshll.u32 %s397_s15, 4  ;;  %s406_s28 = int_to_ptr.vmem [resolvable:$true] %s405_s28 }
  0x52   : > { %s4183_s19 = scalar_select %p3270_p6, 1, 0 }
  0x53   : > { %s4186_s2 = sand.u32 1, %s3013_s10  }
  0x54   : > { %4184 = sst [smem:[#allocation36_spill]] %s4183_s19  ;;  %s3282_s12 = scalar_lea.sflag [#allocation14], %s4186_s2 }
  0x55   : > { %4187 = sst [smem:[#allocation37_spill]] %s3282_s12 }
  0x56   : > { %s3278_s7 = scalar_lea.hbm %s4185_s4, %s2084_s8  ;;  %s2682_s19 = scalar_lea.hbm %s4185_s4, 128 }
  0x57   : > { %s2677_s6 = scalar_lea.hbm %s3278_s7, 64  ;;  %p2683_p11 = scmp.lt.u32.totalorder %s3278_s7, %s4185_s4 }
  0x58   : > { %p2678_p7 = scmp.ne.s32.totalorder %s3278_s7, %s2677_s6  ;;  %p2684_p2 = scmp.lt.u32.totalorder %s2682_s19, %s2677_s6 }
  0x59   : > { %p2686_p1 = scmp.lt.u32.totalorder %s2677_s6, %s3278_s7 }
  0x5a   : > { %p2680_p9 = pnand %p2678_p7, %p3229_p0  ;;  %p2685_p13 = por %p2684_p2, %p2683_p11 }
  0x5c   : > { %p2681_p10 = pneg %p2680_p9  ;;  %p2687_p4 = por %p2686_p1, %p2685_p13 }
  0x5e   : > { %p2688_p8 = pnand %p2687_p4, %p2681_p10 }
  0x60   : > { %2691 = shalt.err (!%p2688_p8)
}
  0x61   : > { %s2692_s27 = scalar_lea.vmem %s406_s28, 64  ;;  %s3019_s2 = smov [#allocation13]  }
  0x62   : > { %p2693_p3 = scmp.ne.s32.totalorder %s406_s28, %s2692_s27  ;;  %s2697_s18 = sshll.u32 %s3019_s2, 4  ;;  %s2698_s18 = int_to_ptr.vmem [resolvable:$false] %s2697_s18 }
  0x63   : > { %s2699_s14 = scalar_lea.vmem %s2698_s18, 128  ;;  %p2700_p9 = scmp.lt.s32.totalorder %s406_s28, %s2698_s18 }
  0x64   : > { %p2695_p5 = pnand %p2693_p3, %p3229_p0  ;;  %p2701_p6 = scmp.lt.s32.totalorder %s2699_s14, %s2692_s27 }
  0x66   : > { %p2696_p7 = pneg %p2695_p5  ;;  %p2702_p12 = por %p2701_p6, %p2700_p9 }
  0x68   : > { %p2703_p2 = pnand %p2702_p12, %p2696_p7 }
  0x6a   : > { %2706 = shalt.err (!%p2703_p2)
}
  0x6b   : > { %p4188_p11 = scmp.ne.s32.totalorder %s4176_s17, 0  ;;  %s48_s19 = sadd.s32 1, %s3005_s29 }
  0x6c   : > { %s51_s18 = sadd.s32 1, %s3009_s30  ;;  %p49_p12 = scmp.ge.s32.totalorder %s48_s19, 2 }
  0x6d   : > { %2437 = dma.hbm_to_vmem [thread:$0]  (!%p4188_p11), %s3278_s7, 64, %s406_s28, %s3282_s12  }
  0x6e   : > { %s55_s6 = ssub.s32 1, %s3009_s30  ;;  %s57_s13 = ssub.s32 1, %s3005_s29 }
  0x6f   : > { %s56_s15 = smul.u32 %s3005_s29, %s55_s6  ;;  %s4262_s19 = smov (%p49_p12, %s48_s19), 0 }
  0x70   : > { %4189 = sst [smem:[#allocation38_spill]] %s4262_s19  ;;  %s4264_s18 = smov (!%p49_p12, %s51_s18), %s3009_s30 }
  0x71   : > { %s58_s8 = smul.u32 %s3009_s30, %s57_s13  ;;  %s62_s27 = ssub.s32 1, %s4262_s19 }
  0x72   : > { %p53_p6 = scmp.ge.s32.totalorder %s4264_s18, 2  ;;  %s68_s28 = sadd.s32 1, %s2993_s26 }
  0x73   : > { %s3313_s7 = sadd.s32 %s58_s8, %s56_s15  ;;  %p75_p10 = scmp.ne.s32.totalorder %s2993_s26, %s2989_s25 }
  0x74   : > { %s4266_s18 = smov (%p53_p6, %s4264_s18), 0  ;;  %p4191_p13 = scmp.eq.s32.totalorder %s3013_s10, 0 }
  0x75   : > { %4190 = sst [smem:[#allocation39_spill]] %s4266_s18  ;;  %p81_p4 = scmp.ne.s32.totalorder %s2989_s25, %s2985_s24 }
  0x76   : > { %p3321_p1 = por %p4191_p13, %p75_p10  ;;  %s60_s14 = ssub.s32 1, %s4266_s18 }
  0x77   : > { %s63_s6 = smul.u32 %s62_s27, %s4266_s18  ;;  %s4193_s15 = sld [smem:[#allocation26_spill]] }
  0x78   : > { %s61_s13 = smul.u32 %s60_s14, %s4262_s19  ;;  %p82_p8 = scmp.eq.s32.totalorder %s3164_s11, 0 }
  0x79   : > { %s91_s8 = ssub.s32 %s3009_s30, %s4266_s18  ;;  %s236_s4 = sadd.s32 1, %s2969_s21 }
  0x7a   : > { %s4194_s29 = sld [smem:[#allocation31_spill]]  ;;  %s64_s12 = sadd.s32 %s63_s6, %s61_s13 }
  0x7b   : > { %p3334_p3 = por %p82_p8, %p81_p4  ;;  %s65_s24 = ssub.s32 %s3313_s7, %s64_s12 }
  0x7c   : > { %p92_p5 = scmp.eq.s32.totalorder %s91_s8, 0  ;;  %p66_p7 = scmp.eq.s32.totalorder %s65_s24, 0 }
  0x7d   : > { %s4195_s5 = scalar_select %p3334_p3, 1, 0 }
  0x7e   : > { %p4196_p9 = scmp.ne.s32.totalorder %s2977_s22, %s2973_s0  ;;  %s4199_s14 = sadd.s32 1, %s2981_s23 }
  0x7f   : > { %s3349_s18 = scalar_select %p92_p5, %s2981_s23, %s4199_s14  }
  0x80   : > { %p3342_p2 = por %p4196_p9, %p82_p8  ;;  %s233_s6 = sor.u32 %s91_s8, %s65_s24 }
  0x81   : > { %4200 = sst [smem:[#allocation40_spill]] %s3349_s18  ;;  %p246_p12 = scmp.ne.s32.totalorder %s2969_s21, %s2965_s20 }
  0x82   : > { %s4197_s27 = scalar_select %p3342_p2, 1, 0 }
  0x83   : > { %s3352_s19 = scalar_select %p66_p7, %s2993_s26, %s68_s28  }
  0x84   : > { %4198 = sst [smem:[#allocation31_spill]] %s4197_s27  ;;  %p234_p6 = scmp.eq.s32.totalorder %s233_s6, 0 }
  0x85   : > { %4201 = sst [smem:[#allocation41_spill]] %s3352_s19  ;;  %p252_p10 = scmp.ne.s32.totalorder %s2965_s20, %s4193_s15 }
  0x86   : > { %p4202_p13 = scmp.eq.s32.totalorder %s3164_s11, 3  ;;  %s325_s0 = sand.u32 1, %s2993_s26  }
  0x87   : > { %s3366_s13 = scalar_select %p234_p6, %s2969_s21, %s236_s4  }
  0x88   : > { %p3360_p4 = por %p4202_p13, %p246_p12  ;;  %p4204_p8 = scmp.ne.s32.totalorder %s4194_s29, 0 }
  0x89   : > { %s2020_s14 = sshll.u32 %s325_s0, 5  ;;  %s2081_s28 = sshll.u32 %s3313_s7, 9 }
  0x8a   : > { %s4203_s12 = scalar_select %p3360_p4, 1, 0 }
  0x8b   : > { %p3370_p9 = por %p4204_p8, %p252_p10  ;;  %s4206_s24 = sld [smem:[#allocation42_spill]] }
  0x8c   : > { %s329_s15 = scalar_lea.vmem [#allocation7], %s2020_s14  ;;  %p4208_p5 = scmp.lt.s32.totalorder %s3013_s10, 4 }
  0x8d   : > { %s4205_s27 = scalar_select %p3370_p9, 1, 0 }
  0x8e   : > { %s341_s26 = sshll.u32 %s329_s15, 4  ;;  %p3384_p7 = pnand %p4208_p5, %p3321_p1  ;;  %s3388_s26 = int_to_ptr.vmem [resolvable:$true] %s341_s26 }
  0x8f   : > { %s3390_s29 = scalar_lea.sflag [#allocation8], %s325_s0 }
  0x90   : > { %p2709_p6 = pneg %p3384_p7 }
  0x91   : > { %s4207_s18 = smov %s4206_s24  ;;  %s3378_s6 = scalar_lea.hbm %s4206_s24, %s2081_s28 }
  0x92   : > { %s2707_s19 = scalar_lea.hbm %s3378_s6, 512  ;;  %s2712_s14 = scalar_lea.hbm %s4207_s18, 1024 }
  0x93   : > { %p2708_p12 = scmp.ne.s32.totalorder %s3378_s6, %s2707_s19  ;;  %p2713_p1 = scmp.lt.u32.totalorder %s3378_s6, %s4207_s18 }
  0x94   : > { %p2714_p8 = scmp.lt.u32.totalorder %s2712_s14, %s2707_s19  ;;  %p2716_p9 = scmp.lt.u32.totalorder %s2707_s19, %s3378_s6 }
  0x95   : > { %p2710_p10 = pnand %p2709_p6, %p2708_p12 }
  0x96   : > { %p2715_p5 = por %p2714_p8, %p2713_p1 }
  0x97   : > { %p2711_p13 = pneg %p2710_p10 }
  0x98   : > { %p2717_p4 = por %p2716_p9, %p2715_p5 }
  0x9a   : > { %p2718_p2 = pnand %p2717_p4, %p2711_p13 }
  0x9c   : > { %2721 = shalt.err (!%p2718_p2)
}
  0x9d   : > { %s2722_s0 = scalar_lea.vmem %s3388_s26, 512  ;;  %s3020_s24 = smov [#allocation7]  }
  0x9e   : > { %p2723_p12 = scmp.ne.s32.totalorder %s3388_s26, %s2722_s0  ;;  %s2727_s15 = sshll.u32 %s3020_s24, 4  ;;  %s2728_s15 = int_to_ptr.vmem [resolvable:$false] %s2727_s15 }
  0x9f   : > { %s2729_s7 = scalar_lea.vmem %s2728_s15, 1024  ;;  %p2730_p11 = scmp.lt.s32.totalorder %s3388_s26, %s2728_s15 }
  0xa0   : > { %p2725_p10 = pnand %p2723_p12, %p2709_p6  ;;  %p2731_p1 = scmp.lt.s32.totalorder %s2729_s7, %s2722_s0 }
  0xa2   : > { %p2726_p3 = pneg %p2725_p10  ;;  %p2732_p8 = por %p2731_p1, %p2730_p11 }
  0xa4   : > { %p2733_p9 = pnand %p2732_p8, %p2726_p3 }
  0xa6   : > { %2736 = shalt.err (!%p2733_p9)
}
  0xa7   : > { %s3021_s19 = smov 128   ;;  %s3022_s2 = smov 8  }
  0xa8   : > { %2428 = dma.hbm_to_vmem [thread:$0]  (!%p3384_p7), %s3378_s6, 512, %s3388_s26, %s3390_s29, %s3021_s19, %s3021_s19, %s3022_s2  }
  0xa9   : > { %s2737_s14 = scalar_lea.hbm %s3261_s16, 8192  ;;  %s2742_s0 = scalar_lea.hbm %s4181_s3, 16384 }
  0xaa   : > { %p2738_p2 = scmp.ne.s32.totalorder %s3261_s16, %s2737_s14  ;;  %p2743_p3 = scmp.lt.u32.totalorder %s3261_s16, %s4181_s3 }
  0xab   : > { %p2744_p6 = scmp.lt.u32.totalorder %s2742_s0, %s2737_s14  ;;  %p2746_p5 = scmp.lt.u32.totalorder %s2737_s14, %s3261_s16 }
  0xac   : > { %p2740_p4 = pnand %p2738_p2, %p3229_p0 }
  0xad   : > { %p2745_p13 = por %p2744_p6, %p2743_p3 }
  0xae   : > { %p2741_p11 = pneg %p2740_p4 }
  0xaf   : > { %p2747_p12 = por %p2746_p5, %p2745_p13 }
  0xb1   : > { %p2748_p10 = pnand %p2747_p12, %p2741_p11 }
  0xb3   : > { %2751 = shalt.err (!%p2748_p10)
}
  0xb4   : > { %s2752_s26 = scalar_lea.vmem %s3266_s1, 8192  ;;  %s3023_s6 = smov [#allocation12]  }
  0xb5   : > { %p2753_p7 = scmp.ne.s32.totalorder %s3266_s1, %s2752_s26  ;;  %s2757_s4 = sshll.u32 %s3023_s6, 4  ;;  %s2758_s4 = int_to_ptr.vmem [resolvable:$false] %s2757_s4 }
  0xb6   : > { %s2759_s29 = scalar_lea.vmem %s2758_s4, 16384  ;;  %p2760_p9 = scmp.lt.s32.totalorder %s3266_s1, %s2758_s4 }
  0xb7   : > { %p2755_p1 = pnand %p2753_p7, %p3229_p0  ;;  %p2761_p2 = scmp.lt.s32.totalorder %s2759_s29, %s2752_s26 }
  0xb9   : > { %p2756_p8 = pneg %p2755_p1  ;;  %p2762_p4 = por %p2761_p2, %p2760_p9 }
  0xbb   : > { %p2763_p3 = pnand %p2762_p4, %p2756_p8 }
  0xbd   : > { %2766 = shalt.err (!%p2763_p3)
}
  0xbe   : > { %p4210_p11 = scmp.ne.s32.totalorder %s4176_s17, 0  ;;  %s4211_s7 = smov 32  }
  0xbf   : > { %s4212_s19 = smov 512   ;;  %s4213_s2 = sld [smem:[#allocation35_spill]] }
  0xc0   : > { %s4214_s14 = sld [smem:[#allocation34_spill]]  ;;  %s2033_s8 = sshll.u32 %s3009_s30, 7 }
  0xc1   : > { %s4215_s15 = sld [smem:[#allocation47_spill]] }
  0xc5   : > { %2434 = dma.hbm_to_vmem [thread:$0]  (!%p4210_p11), %s3261_s16, 8192, %s3266_s1, %s4213_s2, %s4212_s19, %s4212_s19, %s4211_s7  }
  0xc6   : > { %s2032_s28 = sshll.u32 %s4214_s14, 3 }
  0xc7   : > { %s3448_s26 = scalar_lea.hbm %s4215_s15, %s2033_s8  ;;  %s423_s6 = scalar_lea.vmem [#allocation15], %s2032_s28 }
  0xc8   : > { %s430_s4 = sshll.u32 %s423_s6, 4  ;;  %s2767_s29 = scalar_lea.hbm %s3448_s26, 128  ;;  %s431_s4 = int_to_ptr.vmem [resolvable:$true] %s430_s4 }
  0xc9   : > { %p2768_p6 = scmp.ne.s32.totalorder %s3448_s26, %s2767_s29  ;;  %s2772_s7 = scalar_lea.hbm %s4215_s15, 256 }
  0xca   : > { %p2773_p12 = scmp.lt.u32.totalorder %s3448_s26, %s4215_s15  ;;  %p2774_p10 = scmp.lt.u32.totalorder %s2772_s7, %s2767_s29 }
  0xcb   : > { %p2770_p13 = pnand %p2768_p6, %p3229_p0  ;;  %p2776_p1 = scmp.lt.u32.totalorder %s2767_s29, %s3448_s26 }
  0xcc   : > { %p2775_p7 = por %p2774_p10, %p2773_p12 }
  0xcd   : > { %p2771_p5 = pneg %p2770_p13 }
  0xce   : > { %p2777_p8 = por %p2776_p1, %p2775_p7 }
  0xd0   : > { %p2778_p9 = pnand %p2777_p8, %p2771_p5 }
  0xd2   : > { %2781 = shalt.err (!%p2778_p9)
}
  0xd3   : > { %s2782_s14 = scalar_lea.vmem %s431_s4, 128  ;;  %s3024_s28 = smov [#allocation15]  }
  0xd4   : > { %p2783_p2 = scmp.ne.s32.totalorder %s431_s4, %s2782_s14  ;;  %s2787_s8 = sshll.u32 %s3024_s28, 4  ;;  %s2788_s8 = int_to_ptr.vmem [resolvable:$false] %s2787_s8 }
  0xd5   : > { %s2789_s0 = scalar_lea.vmem %s2788_s8, 256  ;;  %p2790_p6 = scmp.lt.s32.totalorder %s431_s4, %s2788_s8 }
  0xd6   : > { %p2785_p4 = pnand %p2783_p2, %p3229_p0  ;;  %p2791_p13 = scmp.lt.s32.totalorder %s2789_s0, %s2782_s14 }
  0xd8   : > { %p2786_p3 = pneg %p2785_p4  ;;  %p2792_p11 = por %p2791_p13, %p2790_p6 }
  0xda   : > { %p2793_p10 = pnand %p2792_p11, %p2786_p3 }
  0xdc   : > { %2796 = shalt.err (!%p2793_p10)
}
  0xdd   : > { %p4216_p12 = scmp.ne.s32.totalorder %s4176_s17, 0  ;;  %s4217_s24 = sld [smem:[#allocation37_spill]] }
  0xde   : > { %s4218_s6 = sld [smem:[#allocation36_spill]] }
  0xe3   : > { %2440 = dma.hbm_to_vmem [thread:$0]  (!%p4216_p12), %s3448_s26, 128, %s431_s4, %s4217_s24  }
  0xe4   : > { %p4219_p5 = scmp.ne.s32.totalorder %s4218_s6, 0 }
  0xe5   : > { %s441_s9 = sand.u32 (!%p4219_p5), 1, %s2989_s25   ;;  %p4220_p0 = scmp.ne.s32.totalorder (!%p4219_p5), %s4195_s5, 0 }
  0xe6   : > { %439 = sbr.rel (%p4219_p5) target bundleno = 1456 (0x5b0), region = 44  ;;  %s2035_s29 = sshll.u32 (!%p4219_p5), %s441_s9, 5 }
  0xe7   : > { %s442_s1 = scalar_lea.sflag (!%p4219_p5), [#allocation8], %s441_s9  ;;  %s3471_s16 = scalar_lea.vmem (!%p4219_p5), [#allocation7], %s2035_s29 }
  0xed   : > { %2940 = dma.done.wait (%p4220_p0), %s442_s1, 512  }
  0xee   : > { %2942 = vsyncadd (%p4220_p0), %s442_s1, 4294966784  ;;  %s4221_s17 = sld [smem:[#allocation31_spill]]  ;;  %s3478_s7 = sand.u32 1, %s3164_s11  }
  0xef   : > { %s452_s26 = sand.u32 1, %s2977_s22   ;;  %s451_s19 = scalar_lea.sflag [#allocation11], %s3478_s7 }
  0xf0   : > { %s2036_s4 = sshll.u32 %s452_s26, 9 }
  0xf1   : > { %s3482_s2 = scalar_lea.vmem [#allocation10], %s2036_s4 }
  0xf4   : > { %p4222_p11 = scmp.ne.s32.totalorder %s4221_s17, 0 }
  0xf6   : > { %2944 = dma.done.wait (%p4222_p11), %s451_s19, 16384  }
  0xf7   : > { %2946 = vsyncadd (%p4222_p11), %s451_s19, 4294950912  ;;  %s2038_s5 = sshll.u32 %s452_s26, 2  ;;  %s3488_s14 = scalar_lea.vmem [#allocation12], %s2036_s4 }
  0xf8   : > { %s469_s28 = scalar_lea.sflag [#allocation14], %s3478_s7  ;;  %s3491_s8 = scalar_lea.vmem [#allocation13], %s2038_s5 }
  0xf9   : > { %2948 = dma.done.wait (%p4222_p11), %s469_s28, 192  }
  0xfa   : > { %2950 = vsyncadd (%p4222_p11), %s469_s28, 4294967104  ;;  %s4223_s11 = sld [smem:[#allocation29_spill]]  ;;  %s3497_s0 = sshll.u32 %s452_s26, 3 }
  0xfb   : > { %s531_s24 = sand.u32 1, %s2965_s20   ;;  %s4224_s4 = sld [smem:[#allocation46_spill]] }
  0xfc   : > { %s2040_s6 = sshll.u32 %s531_s24, 5  ;;  %s481_s19 = scalar_lea.vmem [#allocation15], %s3497_s0 }
  0xfd   : > { %s3508_s5 = scalar_lea.vmem [#allocation16], %s2040_s6  ;;  %s540_s28 = scalar_lea.vmem [#allocation17], %s3497_s0 }
  0xfe   : > { %s4148_s3 = scalar_lea.vmem [#allocation19], %s3497_s0  ;;  %s4225_s26 = sld [smem:[#allocation28_spill]] }
 0x100   : > { %p554_p7 = scmp.lt.s32.totalorder %s4223_s11, 1 }
 0x102   : > { %s4268_s11 = smov (!%p554_p7, %s4223_s11), 1 }
 0x103   : > { %s2043_s9 = sshll.u32 %s4268_s11, 3 }
 0x104   : > { %s557_s17 = scalar_lea.vmem %s4224_s4, %s2043_s9  ;;  %p2044_p1 = scmp.ne.s32.totalorder %s4225_s26, 0 }
 0x105   : > { %v568_v0 = vld [vmem:[%s557_s17] sm:$0xff] (!%p2044_p1)  ;;  %v570_v1 = vld [vmem:[%s481_s19] sm:$0xff] (!%p2044_p1) }
 0x106   : > { %567 = sbr.rel (%p2044_p1) target bundleno = 269 (0x10d), region = 68  ;;  %569 = vst [vmem:[#allocation2] sm:$0xff] (!%p2044_p1), %v568_v0  ;;  %571 = vst [vmem:[#allocation3] sm:$0xff] (!%p2044_p1), %v570_v1 }
 0x10d PF: > { %v577_v2 = vld [vmem:[%s3482_s2 + $0x8] sm:$0xff]  ;;  %v579_v4 = vld [vmem:[%s3482_s2 + $0x18] sm:$0xff]  ;;  %v576_v7 = vld [vmem:[%s3482_s2] sm:$0xff]  ;;  %v3025_v9 = vmov 0.0  }
 0x10e   : > { %v581_v3 = vld [vmem:[%s3482_s2 + $0x28] sm:$0xff]  ;;  %v583_v6 = vld [vmem:[%s3482_s2 + $0x38] sm:$0xff]  ;;  %v580_v8 = vld [vmem:[%s3482_s2 + $0x20] sm:$0xff]  ;;  %726 = vmatprep.mubr.f32.mxu0 %v3025_v9  ;;  %815 = vmatprep.mubr.f32.mxu1 %v3025_v9 }
 0x10f   : > { %v2089_v5 = vpack.c.bf16 %v581_v3, %v577_v2  ;;  %v2121_v10 = vpack.c.bf16 %v583_v6, %v579_v4  ;;  %v2091_v11 = vpack.c.bf16 %v580_v8, %v576_v7  ;;  %v578_v12 = vld [vmem:[%s3482_s2 + $0x10] sm:$0xff]  ;;  %v585_v14 = vld [vmem:[%s3482_s2 + $0x48] sm:$0xff]  ;;  %v587_v17 = vld [vmem:[%s3482_s2 + $0x58] sm:$0xff] }
 0x110   : > { %v582_v13 = vld [vmem:[%s3482_s2 + $0x30] sm:$0xff]  ;;  %v589_v16 = vld [vmem:[%s3482_s2 + $0x68] sm:$0xff]  ;;  %v591_v18 = vld [vmem:[%s3482_s2 + $0x78] sm:$0xff] }
 0x111   : > { %2090 = vmatprep.subr.bf16.mxu0 %v2089_v5  ;;  %v2123_v15 = vpack.c.bf16 %v582_v13, %v578_v12  ;;  %2122 = vmatprep.subr.bf16.mxu1 %v2121_v10  ;;  %v2093_v19 = vpack.c.bf16 %v589_v16, %v585_v14  ;;  %v2125_v20 = vpack.c.bf16 %v591_v18, %v587_v17  ;;  %v584_v21 = vld [vmem:[%s3482_s2 + $0x40] sm:$0xff]  ;;  %v586_v23 = vld [vmem:[%s3482_s2 + $0x50] sm:$0xff]  ;;  %v593_v26 = vld [vmem:[%s3482_s2 + $0x88] sm:$0xff] }
 0x112   : > { %2092 = vmatpush1.bf16.msra.mxu0 %v2091_v11  ;;  %v588_v22 = vld [vmem:[%s3482_s2 + $0x60] sm:$0xff]  ;;  %v590_v25 = vld [vmem:[%s3482_s2 + $0x70] sm:$0xff]  ;;  %v597_v27 = vld [vmem:[%s3482_s2 + $0xa8] sm:$0xff] }
 0x113   : > { %2124 = vmatpush1.bf16.msra.mxu1 %v2123_v15  ;;  %v2095_v24 = vpack.c.bf16 %v588_v22, %v584_v21  ;;  %2094 = vmatprep.subr.bf16.mxu0 %v2093_v19  ;;  %v2127_v28 = vpack.c.bf16 %v590_v25, %v586_v23  ;;  %v2097_v29 = vpack.c.bf16 %v597_v27, %v593_v26  ;;  %v595_v30 = vld [vmem:[%s3482_s2 + $0x98] sm:$0xff]  ;;  %v592_v32 = vld [vmem:[%s3482_s2 + $0x80] sm:$0xff]  ;;  %v594_v35 = vld [vmem:[%s3482_s2 + $0x90] sm:$0xff] }
 0x114   : > { %2126 = vmatprep.subr.bf16.mxu1 %v2125_v20  ;;  %v599_v31 = vld [vmem:[%s3482_s2 + $0xb8] sm:$0xff]  ;;  %v596_v34 = vld [vmem:[%s3482_s2 + $0xa0] sm:$0xff]  ;;  %v598_v36 = vld [vmem:[%s3482_s2 + $0xb0] sm:$0xff] }
 0x115   : > { %v2129_v33 = vpack.c.bf16 %v599_v31, %v595_v30  ;;  %v2099_v37 = vpack.c.bf16 %v596_v34, %v592_v32  ;;  %v601_v38 = vld [vmem:[%s3482_s2 + $0xc8] sm:$0xff]  ;;  %v603_v40 = vld [vmem:[%s3482_s2 + $0xd8] sm:$0xff]  ;;  %v2131_v41 = vpack.c.bf16 %v598_v36, %v594_v35  ;;  %v600_v44 = vld [vmem:[%s3482_s2 + $0xc0] sm:$0xff] }
 0x116   : > { %2096 = vmatpush1.bf16.msra.mxu0 %v2095_v24  ;;  %v605_v39 = vld [vmem:[%s3482_s2 + $0xe8] sm:$0xff]  ;;  %v607_v43 = vld [vmem:[%s3482_s2 + $0xf8] sm:$0xff]  ;;  %v604_v45 = vld [vmem:[%s3482_s2 + $0xe0] sm:$0xff] }
 0x117   : > { %2128 = vmatpush1.bf16.msra.mxu1 %v2127_v28  ;;  %2098 = vmatprep.subr.bf16.mxu0 %v2097_v29  ;;  %v2101_v42 = vpack.c.bf16 %v605_v39, %v601_v38  ;;  %v2133_v46 = vpack.c.bf16 %v607_v43, %v603_v40  ;;  %v602_v47 = vld [vmem:[%s3482_s2 + $0xd0] sm:$0xff]  ;;  %v609_v49 = vld [vmem:[%s3482_s2 + $0x108] sm:$0xff]  ;;  %v611_v51 = vld [vmem:[%s3482_s2 + $0x118] sm:$0xff]  ;;  %v2103_v53 = vpack.c.bf16 %v604_v45, %v600_v44 }
 0x118   : > { %2130 = vmatprep.subr.bf16.mxu1 %v2129_v33  ;;  %v606_v48 = vld [vmem:[%s3482_s2 + $0xf0] sm:$0xff]  ;;  %v613_v50 = vld [vmem:[%s3482_s2 + $0x128] sm:$0xff]  ;;  %v615_v52 = vld [vmem:[%s3482_s2 + $0x138] sm:$0xff] }
 0x119   : > { %v2135_v54 = vpack.c.bf16 %v606_v48, %v602_v47  ;;  %v2105_v55 = vpack.c.bf16 %v613_v50, %v609_v49  ;;  %v608_v56 = vld [vmem:[%s3482_s2 + $0x100] sm:$0xff]  ;;  %v610_v58 = vld [vmem:[%s3482_s2 + $0x110] sm:$0xff]  ;;  %v2137_v59 = vpack.c.bf16 %v615_v52, %v611_v51  ;;  %v617_v61 = vld [vmem:[%s3482_s2 + $0x148] sm:$0xff] }
 0x11a   : > { %2100 = vmatpush1.bf16.msra.mxu0 %v2099_v37  ;;  %v612_v57 = vld [vmem:[%s3482_s2 + $0x120] sm:$0xff]  ;;  %v614_v60 = vld [vmem:[%s3482_s2 + $0x130] sm:$0xff]  ;;  %v621_v62 = vld [vmem:[%s3482_s2 + $0x168] sm:$0xff] }
 0x11b   : > { %2132 = vmatpush1.bf16.msra.mxu1 %v2131_v41  ;;  %2102 = vmatprep.subr.bf16.mxu0 %v2101_v42  ;;  %v619_v63 = vld [vmem:[%s3482_s2 + $0x158] sm:$0xff]  ;;  %v2107_v1 = vpack.c.bf16 %v612_v57, %v608_v56  ;;  %v2139_v2 = vpack.c.bf16 %v614_v60, %v610_v58  ;;  %v2109_v3 = vpack.c.bf16 %v621_v62, %v617_v61  ;;  %v616_v4 = vld [vmem:[%s3482_s2 + $0x140] sm:$0xff]  ;;  %v618_v6 = vld [vmem:[%s3482_s2 + $0x150] sm:$0xff] }
 0x11c   : > { %2134 = vmatprep.subr.bf16.mxu1 %v2133_v46  ;;  %v623_v0 = vld [vmem:[%s3482_s2 + $0x178] sm:$0xff]  ;;  %v620_v5 = vld [vmem:[%s3482_s2 + $0x160] sm:$0xff]  ;;  %v622_v8 = vld [vmem:[%s3482_s2 + $0x170] sm:$0xff] }
 0x11d   : > { %v2141_v7 = vpack.c.bf16 %v623_v0, %v619_v63  ;;  %v625_v10 = vld [vmem:[%s3482_s2 + $0x188] sm:$0xff]  ;;  %v627_v12 = vld [vmem:[%s3482_s2 + $0x198] sm:$0xff]  ;;  %v2111_v14 = vpack.c.bf16 %v620_v5, %v616_v4  ;;  %v2143_v15 = vpack.c.bf16 %v622_v8, %v618_v6  ;;  %v624_v17 = vld [vmem:[%s3482_s2 + $0x180] sm:$0xff] }
 0x11e   : > { %2104 = vmatpush1.bf16.msra.mxu0 %v2103_v53  ;;  %v629_v11 = vld [vmem:[%s3482_s2 + $0x1a8] sm:$0xff]  ;;  %v631_v13 = vld [vmem:[%s3482_s2 + $0x1b8] sm:$0xff]  ;;  %v628_v18 = vld [vmem:[%s3482_s2 + $0x1a0] sm:$0xff] }
 0x11f   : > { %2136 = vmatpush1.bf16.msra.mxu1 %v2135_v54  ;;  %2106 = vmatprep.subr.bf16.mxu0 %v2105_v55  ;;  %v2113_v16 = vpack.c.bf16 %v629_v11, %v625_v10  ;;  %v626_v19 = vld [vmem:[%s3482_s2 + $0x190] sm:$0xff]  ;;  %v2145_v20 = vpack.c.bf16 %v631_v13, %v627_v12  ;;  %v633_v22 = vld [vmem:[%s3482_s2 + $0x1c8] sm:$0xff]  ;;  %v635_v24 = vld [vmem:[%s3482_s2 + $0x1d8] sm:$0xff]  ;;  %v2115_v26 = vpack.c.bf16 %v628_v18, %v624_v17 }
 0x120   : > { %2138 = vmatprep.subr.bf16.mxu1 %v2137_v59  ;;  %v630_v21 = vld [vmem:[%s3482_s2 + $0x1b0] sm:$0xff]  ;;  %v637_v23 = vld [vmem:[%s3482_s2 + $0x1e8] sm:$0xff]  ;;  %v639_v25 = vld [vmem:[%s3482_s2 + $0x1f8] sm:$0xff] }
 0x121   : > { %v2147_v27 = vpack.c.bf16 %v630_v21, %v626_v19  ;;  %v2117_v28 = vpack.c.bf16 %v637_v23, %v633_v22  ;;  %v632_v29 = vld [vmem:[%s3482_s2 + $0x1c0] sm:$0xff]  ;;  %v634_v31 = vld [vmem:[%s3482_s2 + $0x1d0] sm:$0xff]  ;;  %v2149_v32 = vpack.c.bf16 %v639_v25, %v635_v24  ;;  %v857_v34 = vld [vmem:[%s3488_s14 + $0x8] sm:$0xff] }
 0x122   : > { %2108 = vmatpush1.bf16.msra.mxu0 %v2107_v1  ;;  %v636_v30 = vld [vmem:[%s3482_s2 + $0x1e0] sm:$0xff]  ;;  %v638_v33 = vld [vmem:[%s3482_s2 + $0x1f0] sm:$0xff]  ;;  %v861_v35 = vld [vmem:[%s3488_s14 + $0x28] sm:$0xff] }
 0x123   : > { %2140 = vmatpush1.bf16.msra.mxu1 %v2139_v2  ;;  %2110 = vmatprep.subr.bf16.mxu0 %v2109_v3  ;;  %v859_v36 = vld [vmem:[%s3488_s14 + $0x18] sm:$0xff]  ;;  %v2119_v38 = vpack.c.bf16 %v636_v30, %v632_v29  ;;  %v2151_v39 = vpack.c.bf16 %v638_v33, %v634_v31  ;;  %v3583_v40 = vpack.c.bf16 %v861_v35, %v857_v34  ;;  %v856_v41 = vld [vmem:[%s3488_s14] sm:$0xff]  ;;  %v858_v44 = vld [vmem:[%s3488_s14 + $0x10] sm:$0xff] }
 0x124   : > { %2142 = vmatprep.subr.bf16.mxu1 %v2141_v7  ;;  %v863_v37 = vld [vmem:[%s3488_s14 + $0x38] sm:$0xff]  ;;  %v860_v42 = vld [vmem:[%s3488_s14 + $0x20] sm:$0xff]  ;;  %v862_v45 = vld [vmem:[%s3488_s14 + $0x30] sm:$0xff] }
 0x125   : > { %v3587_v43 = vpack.c.bf16 %v863_v37, %v859_v36  ;;  %v865_v46 = vld [vmem:[%s3488_s14 + $0x48] sm:$0xff]  ;;  %v867_v48 = vld [vmem:[%s3488_s14 + $0x58] sm:$0xff]  ;;  %v572_v50 = vld [vmem:[%s3471_s16] sm:$0xff]  ;;  %v3596_v51 = vpack.c.bf16 %v860_v42, %v856_v41  ;;  %v3599_v52 = vpack.c.bf16 %v862_v45, %v858_v44 }
 0x126   : > { %2112 = vmatpush1.bf16.msra.mxu0 %v2111_v14  ;;  %v869_v47 = vld [vmem:[%s3488_s14 + $0x68] sm:$0xff]  ;;  %v871_v49 = vld [vmem:[%s3488_s14 + $0x78] sm:$0xff]  ;;  %v864_v53 = vld [vmem:[%s3488_s14 + $0x40] sm:$0xff] }
 0x127   : > { %2144 = vmatpush1.bf16.msra.mxu1 %v2143_v15  ;;  %2114 = vmatprep.subr.bf16.mxu0 %v2113_v16  ;;  %v868_v54 = vld [vmem:[%s3488_s14 + $0x60] sm:$0xff]  ;;  %v866_v55 = vld [vmem:[%s3488_s14 + $0x50] sm:$0xff]  ;;  %v3605_v56 = vpack.c.bf16 %v869_v47, %v865_v46  ;;  %v3607_v57 = vpack.c.bf16 %v871_v49, %v867_v48  ;;  %v873_v59 = vld [vmem:[%s3488_s14 + $0x88] sm:$0xff] }
 0x128   : > { %2146 = vmatprep.subr.bf16.mxu1 %v2145_v20  ;;  %v870_v58 = vld [vmem:[%s3488_s14 + $0x70] sm:$0xff]  ;;  %v877_v60 = vld [vmem:[%s3488_s14 + $0xa8] sm:$0xff]  ;;  %v875_v61 = vld [vmem:[%s3488_s14 + $0x98] sm:$0xff]  ;;  %v3616_v0 = vpack.c.bf16 %v868_v54, %v864_v53 }
 0x129   : > { %v879_v62 = vld [vmem:[%s3488_s14 + $0xb8] sm:$0xff]  ;;  %v573_v63 = vld [vmem:[%s3471_s16 + $0x8] sm:$0xff]  ;;  %v3620_v1 = vpack.c.bf16 %v870_v58, %v866_v55  ;;  %v3622_v2 = vpack.c.bf16 %v877_v60, %v873_v59  ;;  %v872_v3 = vld [vmem:[%s3488_s14 + $0x80] sm:$0xff] }
 0x12a   : > { %2116 = vmatpush1.bf16.msra.mxu0 %v2115_v26  ;;  %v876_v4 = vld [vmem:[%s3488_s14 + $0xa0] sm:$0xff]  ;;  %v874_v5 = vld [vmem:[%s3488_s14 + $0x90] sm:$0xff]  ;;  %v3629_v6 = vpack.c.bf16 %v879_v62, %v875_v61  ;;  %v881_v8 = vld [vmem:[%s3488_s14 + $0xc8] sm:$0xff] }
 0x12b   : > { %2148 = vmatpush1.bf16.msra.mxu1 %v2147_v27  ;;  %2118 = vmatprep.subr.bf16.mxu0 %v2117_v28  ;;  %v878_v7 = vld [vmem:[%s3488_s14 + $0xb0] sm:$0xff]  ;;  %v885_v10 = vld [vmem:[%s3488_s14 + $0xe8] sm:$0xff]  ;;  %v883_v11 = vld [vmem:[%s3488_s14 + $0xd8] sm:$0xff]  ;;  %v3640_v14 = vpack.c.bf16 %v876_v4, %v872_v3 }
 0x12c   : > { %2150 = vmatprep.subr.bf16.mxu1 %v2149_v32  ;;  %v887_v12 = vld [vmem:[%s3488_s14 + $0xf8] sm:$0xff]  ;;  %v574_v13 = vld [vmem:[%s3471_s16 + $0x10] sm:$0xff]  ;;  %v3644_v15 = vpack.c.bf16 %v878_v7, %v874_v5  ;;  %v3646_v16 = vpack.c.bf16 %v885_v10, %v881_v8  ;;  %v880_v17 = vld [vmem:[%s3488_s14 + $0xc0] sm:$0xff] }
 0x12d   : > { %v884_v18 = vld [vmem:[%s3488_s14 + $0xe0] sm:$0xff]  ;;  %v882_v19 = vld [vmem:[%s3488_s14 + $0xd0] sm:$0xff]  ;;  %v3652_v20 = vpack.c.bf16 %v887_v12, %v883_v11  ;;  %v889_v22 = vld [vmem:[%s3488_s14 + $0x108] sm:$0xff] }
 0x12e   : > { %2120 = vmatpush1.bf16.msra.mxu0 %v2119_v38  ;;  %v886_v21 = vld [vmem:[%s3488_s14 + $0xf0] sm:$0xff]  ;;  %v893_v23 = vld [vmem:[%s3488_s14 + $0x128] sm:$0xff]  ;;  %v891_v24 = vld [vmem:[%s3488_s14 + $0x118] sm:$0xff]  ;;  %v3663_v27 = vpack.c.bf16 %v884_v18, %v880_v17 }
 0x12f   : > { %2152 = vmatpush1.bf16.msra.mxu1 %v2151_v39  ;;  %2154 = vmatprep.subr.bf16.mxu0 %v3583_v40  ;;  %v895_v25 = vld [vmem:[%s3488_s14 + $0x138] sm:$0xff]  ;;  %v3667_v28 = vpack.c.bf16 %v886_v21, %v882_v19  ;;  %v3669_v29 = vpack.c.bf16 %v893_v23, %v889_v22  ;;  %v888_v30 = vld [vmem:[%s3488_s14 + $0x100] sm:$0xff]  ;;  %v890_v32 = vld [vmem:[%s3488_s14 + $0x110] sm:$0xff] }
 0x130   : > { %2186 = vmatprep.subr.bf16.mxu1 %v3587_v43  ;;  %v575_v26 = vld [vmem:[%s3471_s16 + $0x18] sm:$0xff]  ;;  %v892_v31 = vld [vmem:[%s3488_s14 + $0x120] sm:$0xff]  ;;  %v3675_v33 = vpack.c.bf16 %v895_v25, %v891_v24  ;;  %v894_v34 = vld [vmem:[%s3488_s14 + $0x130] sm:$0xff]  ;;  %v642_v25 = vlaneseq  ;;  %s4226_s16 = sld [smem:[#allocation29_spill]] }
 0x131   : > { %727 = vmatmul.mubr.f32.vlgmr.msra.gmra.mrb[0].mxu0 %v572_v50  ;;  %v897_v35 = vld [vmem:[%s3488_s14 + $0x148] sm:$0xff]  ;;  %v899_v37 = vld [vmem:[%s3488_s14 + $0x158] sm:$0xff]  ;;  %v3684_v39 = vpack.c.bf16 %v892_v31, %v888_v30  ;;  %v3689_v41 = vpack.c.bf16 %v894_v34, %v890_v32  ;;  %v896_v44 = vld [vmem:[%s3488_s14 + $0x140] sm:$0xff] }
 0x132   : > { %816 = vmatmul.mubr.f32.vlgmr.msra.gmra.mrb[0].mxu1 %v572_v50  ;;  %2156 = vmatpush1.bf16.msra.mxu0 %v3596_v51  ;;  %v901_v36 = vld [vmem:[%s3488_s14 + $0x168] sm:$0xff]  ;;  %v903_v38 = vld [vmem:[%s3488_s14 + $0x178] sm:$0xff]  ;;  %v900_v45 = vld [vmem:[%s3488_s14 + $0x160] sm:$0xff] }
 0x133   : > { %2188 = vmatpush1.bf16.msra.mxu1 %v3599_v52  ;;  %732 = vmatprep.mubr.f32.mxu0 %v3025_v9  ;;  %v3691_v42 = vpack.c.bf16 %v901_v36, %v897_v35  ;;  %v898_v46 = vld [vmem:[%s3488_s14 + $0x150] sm:$0xff]  ;;  %v3697_v47 = vpack.c.bf16 %v903_v38, %v899_v37  ;;  %v905_v49 = vld [vmem:[%s3488_s14 + $0x188] sm:$0xff]  ;;  %v907_v53 = vld [vmem:[%s3488_s14 + $0x198] sm:$0xff]  ;;  %v3706_v55 = vpack.c.bf16 %v900_v45, %v896_v44 }
 0x134   : > { %2158 = vmatprep.subr.bf16.mxu0 %v3605_v56  ;;  %2190 = vmatprep.subr.bf16.mxu1 %v3607_v57  ;;  %v902_v48 = vld [vmem:[%s3488_s14 + $0x170] sm:$0xff]  ;;  %v909_v50 = vld [vmem:[%s3488_s14 + $0x1a8] sm:$0xff]  ;;  %v911_v54 = vld [vmem:[%s3488_s14 + $0x1b8] sm:$0xff] }
 0x135   : > { %733 = vmatmul.mubr.f32.gmra.mrb[2].mxu0 %v573_v63  ;;  %821 = vmatprep.mubr.f32.mxu1 %v3025_v9  ;;  %v3710_v58 = vpack.c.bf16 %v902_v48, %v898_v46  ;;  %v3712_v59 = vpack.c.bf16 %v909_v50, %v905_v49  ;;  %v904_v60 = vld [vmem:[%s3488_s14 + $0x180] sm:$0xff]  ;;  %v906_v62 = vld [vmem:[%s3488_s14 + $0x190] sm:$0xff]  ;;  %v913_v4 = vld [vmem:[%s3488_s14 + $0x1c8] sm:$0xff] }
 0x136   : > { %2160 = vmatpush1.bf16.msra.mxu0 %v3616_v0  ;;  %738 = vmatprep.mubr.f32.mxu0 %v3025_v9  ;;  %v908_v61 = vld [vmem:[%s3488_s14 + $0x1a0] sm:$0xff]  ;;  %v910_v3 = vld [vmem:[%s3488_s14 + $0x1b0] sm:$0xff]  ;;  %v917_v5 = vld [vmem:[%s3488_s14 + $0x1e8] sm:$0xff]  ;;  %p922_p8 = scmp.eq.s32.totalorder %s4226_s16, 0  ;;  %s923_s29 = ssub.s32 1, %s4226_s16 }
 0x137   : > { %2192 = vmatpush1.bf16.msra.mxu1 %v3620_v1  ;;  %2162 = vmatprep.subr.bf16.mxu0 %v3622_v2  ;;  %v915_v7 = vld [vmem:[%s3488_s14 + $0x1d8] sm:$0xff]  ;;  %v3726_v10 = vpack.c.bf16 %v908_v61, %v904_v60  ;;  %v3730_v11 = vpack.c.bf16 %v910_v3, %v906_v62  ;;  %v3732_v12 = vpack.c.bf16 %v917_v5, %v913_v4  ;;  %v916_v17 = vld [vmem:[%s3488_s14 + $0x1e0] sm:$0xff]  ;;  %v914_v19 = vld [vmem:[%s3488_s14 + $0x1d0] sm:$0xff] }
 0x138   : > { %822 = vmatmul.mubr.f32.gmra.mrb[2].mxu1 %v573_v63  ;;  %2194 = vmatprep.subr.bf16.mxu1 %v3629_v6  ;;  %v3718_v63 = vpack.c.bf16 %v911_v54, %v907_v53  ;;  %v919_v8 = vld [vmem:[%s3488_s14 + $0x1f8] sm:$0xff]  ;;  %v918_v21 = vld [vmem:[%s3488_s14 + $0x1f0] sm:$0xff]  ;;  %v640_v31 = vld [vmem:[%s3491_s8] sm:$0xf]  ;;  %s3801_s2 = scalar_select %p922_p8, 0, 3 }
 0x139   : > { %739 = vmatmul.mubr.f32.gmra.mrb[4].mxu0 %v574_v13  ;;  %827 = vmatprep.mubr.f32.mxu1 %v3025_v9  ;;  %v3737_v18 = vpack.c.bf16 %v919_v8, %v915_v7  ;;  %v3746_v23 = vpack.c.bf16 %v918_v21, %v914_v19  ;;  %v3750_v24 = vld [vmem:[#allocation2] sm:$0xff] }
 0x13a   : > { %2164 = vmatpush1.bf16.msra.mxu0 %v3640_v14  ;;  %744 = vmatprep.mubr.f32.mxu0 %v3025_v9  ;;  %s2046_s8 = sshll.u32 %s3801_s2, 3 }
 0x13b   : > { %2196 = vmatpush1.bf16.msra.mxu1 %v3644_v15  ;;  %2166 = vmatprep.subr.bf16.mxu0 %v3646_v16  ;;  %s933_s11 = sshra.s32 %s2046_s8, 3 }
 0x13c   : > { %828 = vmatmul.mubr.f32.gmra.mrb[4].mxu1 %v574_v13  ;;  %2198 = vmatprep.subr.bf16.mxu1 %v3652_v20  ;;  %v912_v13 = vld [vmem:[%s3488_s14 + $0x1c0] sm:$0xff]  ;;  %s4227_s14 = sld [smem:[#allocation28_spill]]  ;;  %s2085_s6 = sshll.u32 %s933_s11, 5 }
 0x13d   : > { %745 = vmatmul.mubr.f32.gmra.mrb[6].mxu0 %v575_v26  ;;  %833 = vmatprep.mubr.f32.mxu1 %v3025_v9  ;;  %v3742_v22 = vpack.c.bf16 %v916_v17, %v912_v13  ;;  %s937_s9 = scalar_lea.vmem [#allocation4], %s2085_s6 }
 0x13e   : > { %2168 = vmatpush1.bf16.msra.mxu0 %v3663_v27  ;;  %1006 = vmatprep.mubr.f32.mxu0 %v3025_v9 }
 0x13f   : > { %2200 = vmatpush1.bf16.msra.mxu1 %v3667_v28  ;;  %2170 = vmatprep.subr.bf16.mxu0 %v3669_v29 }
 0x140   : > { %834 = vmatmul.mubr.f32.gmra.mrb[6].mxu1 %v575_v26  ;;  %2202 = vmatprep.subr.bf16.mxu1 %v3675_v33  ;;  %v3791_v26 = vshrl.u32 %v642_v25, 7 }
 0x141   : > { %1077 = vmatprep.mubr.f32.mxu1 %v3025_v9 }
 0x142   : > { %2172 = vmatpush1.bf16.msra.mxu0 %v3684_v39  ;;  %v644_v30 = vsub.s32 0, %v3791_v26  ;;  %v648_v32 = vsub.s32 1, %v3791_v26  ;;  %v652_v34 = vsub.s32 2, %v3791_v26  ;;  %v656_v35 = vsub.s32 3, %v3791_v26  ;;  %s925_s1 = ssub.s32 1, %s4227_s14  ;;  %s924_s4 = smul.u32 %s4227_s14, %s923_s29 }
 0x143   : > { %2204 = vmatpush1.bf16.msra.mxu1 %v3689_v41  ;;  %2174 = vmatprep.subr.bf16.mxu0 %v3691_v42  ;;  %s926_s17 = smul.u32 %s4226_s16, %s925_s1  ;;  %p2070_p9 = scmp.ne.s32.totalorder %s4227_s14, 1 }
 0x144   : > { %2206 = vmatprep.subr.bf16.mxu1 %v3697_v47  ;;  %v645_v36 = vrot.slane %v640_v31, %v644_v30  ;;  %v649_v37 = vrot.slane %v640_v31, %v648_v32  ;;  %v653_v38 = vrot.slane %v640_v31, %v652_v34  ;;  %v657_v44 = vrot.slane %v640_v31, %v656_v35 }
 0x145   : > { %s927_s19 = sadd.s32 %s926_s17, %s924_s4 }
 0x146   : > { %2176 = vmatpush1.bf16.msra.mxu0 %v3706_v55  ;;  %s3810_s26 = sshll.u32 %s927_s19, 2 }
 0x147   : > { %2208 = vmatpush1.bf16.msra.mxu1 %v3710_v58  ;;  %2178 = vmatprep.subr.bf16.mxu0 %v3712_v59  ;;  %s1112_s11 = sadd.s32 %s3810_s26, %s3801_s2 }
 0x148   : > { %2210 = vmatprep.subr.bf16.mxu1 %v3718_v63  ;;  %s1113_s6 = sld [smem:[#allocation6 + %s1112_s11]] }
 0x149   : > { %s3862_s2 = scalar_select %p922_p8, 1, 2 }
 0x14a   : > { %2180 = vmatpush1.bf16.msra.mxu0 %v3726_v10 }
 0x14b   : > { %2212 = vmatpush1.bf16.msra.mxu1 %v3730_v11  ;;  %2182 = vmatprep.subr.bf16.mxu0 %v3732_v12  ;;  %s1301_s17 = sadd.s32 %s3810_s26, %s3862_s2 }
 0x14c   : > { %2214 = vmatprep.subr.bf16.mxu1 %v3737_v18  ;;  %s1302_s19 = sld [smem:[#allocation6 + %s1301_s17]] }
 0x14e   : > { %2184 = vmatpush1.bf16.msra.mxu0 %v3742_v22 }
 0x14f   : > { %2216 = vmatpush1.bf16.msra.mxu1 %v3746_v23  ;;  %2218 = vmatprep.subr.bf16.mxu0 %v3583_v40 }
 0x150   : > { %2250 = vmatprep.subr.bf16.mxu1 %v3587_v43 }
 0x151   : > { %1007 = vmatmul.mubr.f32.vlgmr.msra.gmra.mrb[8].mxu0 %v3750_v24 }
 0x152   : > { %1078 = vmatmul.mubr.f32.vlgmr.msra.gmra.mrb[8].mxu1 %v3750_v24  ;;  %2220 = vmatpush1.bf16.msra.mxu0 %v3596_v51 }
 0x153   : > { %2252 = vmatpush1.bf16.msra.mxu1 %v3599_v52  ;;  %2222 = vmatprep.subr.bf16.mxu0 %v3605_v56 }
 0x154   : > { %2254 = vmatprep.subr.bf16.mxu1 %v3607_v57  ;;  %1195 = vmatprep.mubr.f32.mxu0 %v3025_v9 }
 0x155   : > { %1266 = vmatprep.mubr.f32.mxu1 %v3025_v9 }
 0x156   : > { %2224 = vmatpush1.bf16.msra.mxu0 %v3616_v0 }
 0x157   : > { %2256 = vmatpush1.bf16.msra.mxu1 %v3620_v1  ;;  %2226 = vmatprep.subr.bf16.mxu0 %v3622_v2 }
 0x158   : > { %2258 = vmatprep.subr.bf16.mxu1 %v3629_v6 }
 0x15a   : > { %2228 = vmatpush1.bf16.msra.mxu0 %v3640_v14 }
 0x15b   : > { %2260 = vmatpush1.bf16.msra.mxu1 %v3644_v15  ;;  %2230 = vmatprep.subr.bf16.mxu0 %v3646_v16 }
 0x15c   : > { %2262 = vmatprep.subr.bf16.mxu1 %v3652_v20 }
 0x15e   : > { %2232 = vmatpush1.bf16.msra.mxu0 %v3663_v27 }
 0x15f   : > { %2264 = vmatpush1.bf16.msra.mxu1 %v3667_v28  ;;  %2234 = vmatprep.subr.bf16.mxu0 %v3669_v29 }
 0x160   : > { %2266 = vmatprep.subr.bf16.mxu1 %v3675_v33 }
 0x162   : > { %2236 = vmatpush1.bf16.msra.mxu0 %v3684_v39 }
 0x163   : > { %2268 = vmatpush1.bf16.msra.mxu1 %v3689_v41  ;;  %2238 = vmatprep.subr.bf16.mxu0 %v3691_v42 }
 0x164   : > { %2270 = vmatprep.subr.bf16.mxu1 %v3697_v47 }
 0x166   : > { %2240 = vmatpush1.bf16.msra.mxu0 %v3706_v55 }
 0x167   : > { %2272 = vmatpush1.bf16.msra.mxu1 %v3710_v58  ;;  %2242 = vmatprep.subr.bf16.mxu0 %v3712_v59 }
 0x168   : > { %2274 = vmatprep.subr.bf16.mxu1 %v3718_v63 }
 0x16a   : > { %2244 = vmatpush1.bf16.msra.mxu0 %v3726_v10 }
 0x16b   : > { %2276 = vmatpush1.bf16.msra.mxu1 %v3730_v11  ;;  %2246 = vmatprep.subr.bf16.mxu0 %v3732_v12 }
 0x16c   : > { %2278 = vmatprep.subr.bf16.mxu1 %v3737_v18 }
 0x16e   : > { %2248 = vmatpush1.bf16.msra.mxu0 %v3742_v22 }
 0x16f   : > { %2280 = vmatpush1.bf16.msra.mxu1 %v3746_v23  ;;  %2282 = vmatprep.subr.bf16.mxu0 %v3583_v40 }
 0x170   : > { %2314 = vmatprep.subr.bf16.mxu1 %v3587_v43 }
 0x204   : > { %v728_v45 = vpop.f32.mrb[0].mxu0 }
 0x205   : > { %v729_v46 = vadd.f32 %v728_v45, %v645_v36  ;;  %v730_v48 = vpop.f32.mrb[1].mxu0  ;;  %v817_v49 = vpop.f32.mrb[0].mxu1 }
 0x206   : > { %v731_v50 = vadd.f32 %v730_v48, %v649_v37  ;;  %v818_v53 = vadd.f32 %v817_v49, %v653_v38  ;;  %v819_v54 = vpop.f32.mrb[1].mxu1 }
 0x207   : > { %840 = vst [vmem:[#allocation4] sm:$0xff] %v729_v46  ;;  %v820_v60 = vadd.f32 %v819_v54, %v657_v44 }
 0x208   : > { %841 = vst [vmem:[#allocation4 + $0x8] sm:$0xff] %v731_v50  ;;  %v734_v61 = vpop.f32.mrb[2].mxu0  ;;  %842 = vst [vmem:[#allocation4 + $0x10] sm:$0xff] %v818_v53 }
 0x209   : > { %v735_v62 = vadd.f32 %v734_v61, %v645_v36  ;;  %v736_v3 = vpop.f32.mrb[3].mxu0  ;;  %843 = vst [vmem:[#allocation4 + $0x18] sm:$0xff] %v820_v60 }
 0x20a   : > { %v737_v4 = vadd.f32 %v736_v3, %v649_v37 }
 0x20b   : > { %844 = vst [vmem:[#allocation4 + $0x20] sm:$0xff] %v735_v62  ;;  %v823_v5 = vpop.f32.mrb[2].mxu1 }
 0x20c   : > { %845 = vst [vmem:[#allocation4 + $0x28] sm:$0xff] %v737_v4  ;;  %v740_v7 = vpop.f32.mrb[4].mxu0  ;;  %v824_v8 = vadd.f32 %v823_v5, %v653_v38  ;;  %v825_v13 = vpop.f32.mrb[3].mxu1 }
 0x20d   : > { %v741_v17 = vadd.f32 %v740_v7, %v645_v36  ;;  %v742_v19 = vpop.f32.mrb[5].mxu0  ;;  %v826_v21 = vadd.f32 %v825_v13, %v657_v44 }
 0x20e   : > { %v743_v25 = vadd.f32 %v742_v19, %v649_v37  ;;  %846 = vst [vmem:[#allocation4 + $0x30] sm:$0xff] %v824_v8 }
 0x20f   : > { %848 = vst [vmem:[#allocation4 + $0x40] sm:$0xff] %v741_v17  ;;  %847 = vst [vmem:[#allocation4 + $0x38] sm:$0xff] %v826_v21  ;;  %v829_v30 = vpop.f32.mrb[4].mxu1 }
 0x210   : > { %849 = vst [vmem:[#allocation4 + $0x48] sm:$0xff] %v743_v25  ;;  %v746_v31 = vpop.f32.mrb[6].mxu0  ;;  %v830_v32 = vadd.f32 %v829_v30, %v653_v38  ;;  %v831_v34 = vpop.f32.mrb[5].mxu1 }
 0x211   : > { %v747_v35 = vadd.f32 %v746_v31, %v645_v36  ;;  %v748_v45 = vpop.f32.mrb[7].mxu0  ;;  %v832_v46 = vadd.f32 %v831_v34, %v657_v44 }
 0x212   : > { %v749_v48 = vadd.f32 %v748_v45, %v649_v37  ;;  %850 = vst [vmem:[#allocation4 + $0x50] sm:$0xff] %v830_v32 }
 0x213   : > { %852 = vst [vmem:[#allocation4 + $0x60] sm:$0xff] %v747_v35  ;;  %851 = vst [vmem:[#allocation4 + $0x58] sm:$0xff] %v832_v46  ;;  %v835_v49 = vpop.f32.mrb[6].mxu1  ;;  %v930_v35 = vld [vmem:[#allocation3] sm:$0xff]  ;;  %v1114_v46 = vstv %s1113_s6  ;;  %s3917_s6 = scalar_select %p922_p8, 2, 1 }
 0x214   : > { %853 = vst [vmem:[#allocation4 + $0x68] sm:$0xff] %v749_v48  ;;  %v836_v50 = vadd.f32 %v835_v49, %v653_v38  ;;  %v837_v53 = vpop.f32.mrb[7].mxu1  ;;  %vm1115_vm0 = vcmp.lt.s32.totalorder %v3791_v26, %v1114_v46 }
 0x215   : > { %v838_v54 = vadd.f32 %v837_v53, %v657_v44 }
 0x216   : > { %854 = vst [vmem:[#allocation4 + $0x70] sm:$0xff] %v836_v50 }
 0x217   : > { %855 = vst [vmem:[#allocation4 + $0x78] sm:$0xff] %v838_v54 }
 0x21e   : > { %v938_v36 = vld [vmem:[%s937_s9] sm:$0xff]  ;;  %v939_v61 = vld [vmem:[%s937_s9 + $0x8] sm:$0xff]  ;;  %v941_v7 = vld [vmem:[%s937_s9 + $0x18] sm:$0xff] }
 0x21f   : > { %v940_v13 = vld [vmem:[%s937_s9 + $0x10] sm:$0xff]  ;;  %s1118_s9 = scalar_lea.vmem %s3508_s5, %s2046_s8 [#allocation16]  ;;  %s2052_s8 = sshll.u32 %s3862_s2, 3 }
 0x220   : > { %s1122_s29 = sshra.s32 %s2052_s8, 3  ;;  %s1307_s11 = scalar_lea.vmem %s3508_s5, %s2052_s8 [#allocation16] }
 0x221   : > { %s2086_s1 = sshll.u32 %s1122_s29, 5 }
 0x222   : > { %s1126_s4 = scalar_lea.vmem [#allocation4], %s2086_s1  ;;  %s1490_s1 = sadd.s32 %s3810_s26, %s3917_s6 }
 0x224   : > { %v1008_v37 = vpop.f32.mrb[8].mxu0 }
 0x225   : > { %v1084_v38 = vadd.f32 %v1008_v37, %v938_v36  ;;  %v1079_v60 = vpop.f32.mrb[8].mxu1  ;;  %v1010_v62 = vpop.f32.mrb[9].mxu0 }
 0x226   : > { %v1085_v3 = vadd.f32 %v1010_v62, %v939_v61  ;;  %v1081_v4 = vpop.f32.mrb[9].mxu1  ;;  %v1086_v19 = vadd.f32 %v1079_v60, %v940_v13 }
 0x227   : > { %v2049_v44 = vmul.f32 -1.442695, %v1084_v38  ;;  %v1087_v8 = vadd.f32 %v1081_v4, %v941_v7  ;;  %v1128_v7 = vld [vmem:[%s1126_s4 + $0x8] sm:$0xff] }
 0x228   : > { %v2050_v5 = vmul.f32 -1.442695, %v1085_v3  ;;  %v1129_v3 = vld [vmem:[%s1126_s4 + $0x10] sm:$0xff] }
 0x229   : > { %2573 = vpow2.f32 %v2049_v44  ;;  %v2051_v17 = vmul.f32 -1.442695, %v1087_v8 }
 0x22a   : > { %2575 = vpow2.f32 %v2050_v5 }
 0x22b   : > { %2577 = vpow2.f32 %v2051_v17 }
 0x22c   : > { %2579 = vtanh.f32 %v1086_v19 }
 0x233   : > { %v2574_v21 = vpop.eup %2573 }
 0x234   : > { %v2576_v25 = vpop.eup %2575  ;;  %v1091_v30 = vadd.f32 1.0, %v2574_v21 }
 0x235   : > { %v1097_v31 = vadd.f32 1.0, %v2576_v25  ;;  %v2578_v32 = vpop.eup %2577 }
 0x236   : > { %2581 = vrcp.f32 %v1091_v30  ;;  %v2580_v34 = vpop.eup %2579  ;;  %v1104_v50 = vadd.f32 1.0, %v2578_v32 }
 0x237   : > { %2583 = vrcp.f32 %v1097_v31 }
 0x238   : > { %2585 = vrcp.f32 %v1104_v50 }
 0x240   : > { %v2582_v45 = vpop.eup %2581 }
 0x241   : > { %v2584_v48 = vpop.eup %2583  ;;  %v1108_v49 = vmul.f32 %v2582_v45, %v2580_v34 }
 0x242   : > { %v1107_v53 = vmul.f32 %v2584_v48, %v930_v35  ;;  %v2586_v37 = vpop.eup %2585  ;;  %v1303_v48 = vstv %s1302_s19  ;;  %s3933_s19 = scalar_select %p922_p8, 3, 0 }
 0x243   : > { %vm1304_vm1 = vcmp.lt.s32.totalorder %v3791_v26, %v1303_v48 }
 0x244   : > { %v1109_v54 = vadd.f32 %v1108_v49, %v1107_v53  ;;  %s1679_s16 = sadd.s32 %s3810_s26, %s3933_s19 }
 0x246   : > { %2587 = vtanh.f32 %v1109_v54  ;;  %v3815_v36 = vsel %vm1115_vm0, %v1109_v54, %v930_v35 }
 0x250   : > { %v2588_v38 = vpop.eup %2587 }
 0x251   : > { %v1111_v60 = vmul.f32 %v2588_v38, %v2586_v37 }
 0x253   : > { %v3821_v61 = vsel %vm1115_vm0, %v1111_v60, %v3750_v24  ;;  %v1127_v24 = vld [vmem:[%s1126_s4] sm:$0xff] }
 0x254   : > { %1119 = vst [vmem:[%s1118_s9] sm:$0xff] %v3821_v61  ;;  %1196 = vmatmul.mubr.f32.vlgmr.msra.gmra.mrb[10].mxu0 %v3821_v61  ;;  %1267 = vmatmul.mubr.f32.vlgmr.msra.gmra.mrb[10].mxu1 %v3821_v61  ;;  %s2058_s9 = sshll.u32 %s3917_s6, 3  ;;  %s1680_s6 = sld [smem:[#allocation6 + %s1679_s16]] }
 0x255   : > { %2284 = vmatpush1.bf16.msra.mxu0 %v3596_v51  ;;  %2316 = vmatpush1.bf16.msra.mxu1 %v3599_v52  ;;  %s1311_s2 = sshra.s32 %s2058_s9, 3  ;;  %s1496_s17 = scalar_lea.vmem %s3508_s5, %s2058_s9 [#allocation16] }
 0x256   : > { %2286 = vmatprep.subr.bf16.mxu0 %v3605_v56  ;;  %2318 = vmatprep.subr.bf16.mxu1 %v3607_v57  ;;  %s2087_s8 = sshll.u32 %s1311_s2, 5 }
 0x257   : > { %1384 = vmatprep.mubr.f32.mxu0 %v3025_v9  ;;  %1455 = vmatprep.mubr.f32.mxu1 %v3025_v9  ;;  %s1315_s29 = scalar_lea.vmem [#allocation4], %s2087_s8 }
 0x259   : > { %2288 = vmatpush1.bf16.msra.mxu0 %v3616_v0  ;;  %2320 = vmatpush1.bf16.msra.mxu1 %v3620_v1 }
 0x25a   : > { %2290 = vmatprep.subr.bf16.mxu0 %v3622_v2  ;;  %2322 = vmatprep.subr.bf16.mxu1 %v3629_v6 }
 0x25d   : > { %2292 = vmatpush1.bf16.msra.mxu0 %v3640_v14  ;;  %2324 = vmatpush1.bf16.msra.mxu1 %v3644_v15 }
 0x25e   : > { %2294 = vmatprep.subr.bf16.mxu0 %v3646_v16  ;;  %2326 = vmatprep.subr.bf16.mxu1 %v3652_v20 }
 0x261   : > { %2296 = vmatpush1.bf16.msra.mxu0 %v3663_v27  ;;  %2328 = vmatpush1.bf16.msra.mxu1 %v3667_v28 }
 0x262   : > { %2298 = vmatprep.subr.bf16.mxu0 %v3669_v29  ;;  %2330 = vmatprep.subr.bf16.mxu1 %v3675_v33 }
 0x265   : > { %2300 = vmatpush1.bf16.msra.mxu0 %v3684_v39  ;;  %2332 = vmatpush1.bf16.msra.mxu1 %v3689_v41 }
 0x266   : > { %2302 = vmatprep.subr.bf16.mxu0 %v3691_v42  ;;  %2334 = vmatprep.subr.bf16.mxu1 %v3697_v47 }
 0x269   : > { %2304 = vmatpush1.bf16.msra.mxu0 %v3706_v55  ;;  %2336 = vmatpush1.bf16.msra.mxu1 %v3710_v58 }
 0x26a   : > { %2306 = vmatprep.subr.bf16.mxu0 %v3712_v59  ;;  %2338 = vmatprep.subr.bf16.mxu1 %v3718_v63 }
 0x26d   : > { %2308 = vmatpush1.bf16.msra.mxu0 %v3726_v10  ;;  %2340 = vmatpush1.bf16.msra.mxu1 %v3730_v11 }
 0x26e   : > { %2310 = vmatprep.subr.bf16.mxu0 %v3732_v12  ;;  %2342 = vmatprep.subr.bf16.mxu1 %v3737_v18 }
 0x271   : > { %2312 = vmatpush1.bf16.msra.mxu0 %v3742_v22  ;;  %2344 = vmatpush1.bf16.msra.mxu1 %v3746_v23 }
 0x272   : > { %2346 = vmatprep.subr.bf16.mxu0 %v3583_v40  ;;  %2378 = vmatprep.subr.bf16.mxu1 %v3587_v43  ;;  %v1130_v43 = vld [vmem:[%s1126_s4 + $0x18] sm:$0xff]  ;;  %s1491_s4 = sld [smem:[#allocation6 + %s1490_s1]] }
 0x327   : > { %v1197_v62 = vpop.f32.mrb[10].mxu0  ;;  %v1268_v4 = vpop.f32.mrb[10].mxu1 }
 0x328   : > { %v1273_v44 = vadd.f32 %v1197_v62, %v1127_v24  ;;  %v1275_v5 = vadd.f32 %v1268_v4, %v1129_v3  ;;  %v1199_v40 = vpop.f32.mrb[11].mxu0  ;;  %v1270_v8 = vpop.f32.mrb[11].mxu1 }
 0x329   : > { %v1274_v13 = vadd.f32 %v1199_v40, %v1128_v7  ;;  %v1276_v17 = vadd.f32 %v1270_v8, %v1130_v43 }
 0x32a   : > { %v2055_v19 = vmul.f32 -1.442695, %v1273_v44 }
 0x32b   : > { %v2056_v21 = vmul.f32 -1.442695, %v1274_v13  ;;  %v2057_v25 = vmul.f32 -1.442695, %v1276_v17 }
 0x32c   : > { %2589 = vpow2.f32 %v2055_v19 }
 0x32d   : > { %2591 = vpow2.f32 %v2056_v21 }
 0x32e   : > { %2593 = vpow2.f32 %v2057_v25 }
 0x32f   : > { %2595 = vtanh.f32 %v1275_v5 }
 0x336   : > { %v2590_v30 = vpop.eup %2589 }
 0x337   : > { %v2592_v31 = vpop.eup %2591  ;;  %v1280_v32 = vadd.f32 1.0, %v2590_v30 }
 0x338   : > { %v1286_v34 = vadd.f32 1.0, %v2592_v31  ;;  %v2594_v35 = vpop.eup %2593 }
 0x339   : > { %2597 = vrcp.f32 %v1280_v32  ;;  %v2596_v45 = vpop.eup %2595  ;;  %v1293_v53 = vadd.f32 1.0, %v2594_v35 }
 0x33a   : > { %2599 = vrcp.f32 %v1286_v34 }
 0x33b   : > { %2601 = vrcp.f32 %v1293_v53  ;;  %v1681_v53 = vstv %s1680_s6 }
 0x33c   : > { %vm1682_vm3 = vcmp.lt.s32.totalorder %v3791_v26, %v1681_v53 }
 0x343   : > { %v2598_v46 = vpop.eup %2597 }
 0x344   : > { %v2600_v49 = vpop.eup %2599  ;;  %v1297_v50 = vmul.f32 %v2598_v46, %v2596_v45 }
 0x345   : > { %v1296_v54 = vmul.f32 %v2600_v49, %v3815_v36  ;;  %v2602_v60 = vpop.eup %2601 }
 0x347   : > { %v1298_v37 = vadd.f32 %v1297_v50, %v1296_v54 }
 0x349   : > { %2603 = vtanh.f32 %v1298_v37  ;;  %v3872_v38 = vsel %vm1304_vm1, %v1298_v37, %v3815_v36 }
 0x353   : > { %v2604_v24 = vpop.eup %2603 }
 0x354   : > { %v1300_v62 = vmul.f32 %v2604_v24, %v2602_v60 }
 0x356   : > { %v3878_v3 = vsel %vm1304_vm1, %v1300_v62, %v3821_v61 }
 0x357   : > { %1308 = vst [vmem:[%s1307_s11] sm:$0xff] %v3878_v3  ;;  %1385 = vmatmul.mubr.f32.vlgmr.msra.gmra.mrb[12].mxu0 %v3878_v3  ;;  %1456 = vmatmul.mubr.f32.vlgmr.msra.gmra.mrb[12].mxu1 %v3878_v3  ;;  %s2064_s11 = sshll.u32 %s3933_s19, 3 }
 0x358   : > { %2348 = vmatpush1.bf16.msra.mxu0 %v3596_v51  ;;  %2380 = vmatpush1.bf16.msra.mxu1 %v3599_v52  ;;  %v1318_v52 = vld [vmem:[%s1315_s29 + $0x10] sm:$0xff]  ;;  %s1500_s2 = sshra.s32 %s2064_s11, 3  ;;  %s1685_s9 = scalar_lea.vmem %s3508_s5, %s2064_s11 [#allocation16] }
 0x359   : > { %2350 = vmatprep.subr.bf16.mxu0 %v3605_v56  ;;  %2382 = vmatprep.subr.bf16.mxu1 %v3607_v57  ;;  %s2088_s8 = sshll.u32 %s1500_s2, 5 }
 0x35a   : > { %1573 = vmatprep.mubr.f32.mxu0 %v3025_v9  ;;  %1644 = vmatprep.mubr.f32.mxu1 %v3025_v9  ;;  %v1316_v9 = vld [vmem:[%s1315_s29] sm:$0xff] }
 0x35c   : > { %2352 = vmatpush1.bf16.msra.mxu0 %v3616_v0  ;;  %2384 = vmatpush1.bf16.msra.mxu1 %v3620_v1  ;;  %v1317_v1 = vld [vmem:[%s1315_s29 + $0x8] sm:$0xff] }
 0x35d   : > { %2354 = vmatprep.subr.bf16.mxu0 %v3622_v2  ;;  %2386 = vmatprep.subr.bf16.mxu1 %v3629_v6  ;;  %v1319_v6 = vld [vmem:[%s1315_s29 + $0x18] sm:$0xff]  ;;  %s1504_s29 = scalar_lea.vmem [#allocation4], %s2088_s8 }
 0x35e   : > { %v1505_v4 = vld [vmem:[%s1504_s29] sm:$0xff]  ;;  %v1507_v5 = vld [vmem:[%s1504_s29 + $0x10] sm:$0xff]  ;;  %v1506_v8 = vld [vmem:[%s1504_s29 + $0x8] sm:$0xff] }
 0x35f   : > { %v1508_v17 = vld [vmem:[%s1504_s29 + $0x18] sm:$0xff] }
 0x360   : > { %2356 = vmatpush1.bf16.msra.mxu0 %v3640_v14  ;;  %2388 = vmatpush1.bf16.msra.mxu1 %v3644_v15 }
 0x361   : > { %2358 = vmatprep.subr.bf16.mxu0 %v3646_v16  ;;  %2390 = vmatprep.subr.bf16.mxu1 %v3652_v20 }
 0x364   : > { %2360 = vmatpush1.bf16.msra.mxu0 %v3663_v27  ;;  %2392 = vmatpush1.bf16.msra.mxu1 %v3667_v28 }
 0x365   : > { %2362 = vmatprep.subr.bf16.mxu0 %v3669_v29  ;;  %2394 = vmatprep.subr.bf16.mxu1 %v3675_v33 }
 0x368   : > { %2364 = vmatpush1.bf16.msra.mxu0 %v3684_v39  ;;  %2396 = vmatpush1.bf16.msra.mxu1 %v3689_v41 }
 0x369   : > { %2366 = vmatprep.subr.bf16.mxu0 %v3691_v42  ;;  %2398 = vmatprep.subr.bf16.mxu1 %v3697_v47 }
 0x36c   : > { %2368 = vmatpush1.bf16.msra.mxu0 %v3706_v55  ;;  %2400 = vmatpush1.bf16.msra.mxu1 %v3710_v58  ;;  %v1492_v58 = vstv %s1491_s4 }
 0x36d   : > { %2370 = vmatprep.subr.bf16.mxu0 %v3712_v59  ;;  %2402 = vmatprep.subr.bf16.mxu1 %v3718_v63  ;;  %vm1493_vm2 = vcmp.lt.s32.totalorder %v3791_v26, %v1492_v58 }
 0x370   : > { %2372 = vmatpush1.bf16.msra.mxu0 %v3726_v10  ;;  %2404 = vmatpush1.bf16.msra.mxu1 %v3730_v11 }
 0x371   : > { %2374 = vmatprep.subr.bf16.mxu0 %v3732_v12  ;;  %2406 = vmatprep.subr.bf16.mxu1 %v3737_v18 }
 0x374   : > { %2376 = vmatpush1.bf16.msra.mxu0 %v3742_v22  ;;  %2408 = vmatpush1.bf16.msra.mxu1 %v3746_v23 }
 0x42a   : > { %v1386_v51 = vpop.f32.mrb[12].mxu0  ;;  %v1457_v56 = vpop.f32.mrb[12].mxu1 }
 0x42b   : > { %v1462_v57 = vadd.f32 %v1386_v51, %v1316_v9  ;;  %v1464_v0 = vadd.f32 %v1457_v56, %v1318_v52  ;;  %v1388_v2 = vpop.f32.mrb[13].mxu0  ;;  %v1459_v14 = vpop.f32.mrb[13].mxu1 }
 0x42c   : > { %v1463_v15 = vadd.f32 %v1388_v2, %v1317_v1  ;;  %v1465_v16 = vadd.f32 %v1459_v14, %v1319_v6 }
 0x42d   : > { %v2061_v20 = vmul.f32 -1.442695, %v1462_v57 }
 0x42e   : > { %v2062_v27 = vmul.f32 -1.442695, %v1463_v15  ;;  %v2063_v28 = vmul.f32 -1.442695, %v1465_v16 }
 0x42f   : > { %2605 = vpow2.f32 %v2061_v20 }
 0x430   : > { %2607 = vpow2.f32 %v2062_v27 }
 0x431   : > { %2609 = vpow2.f32 %v2063_v28 }
 0x432   : > { %2611 = vtanh.f32 %v1464_v0 }
 0x439   : > { %v2606_v29 = vpop.eup %2605 }
 0x43a   : > { %v2608_v33 = vpop.eup %2607  ;;  %v1469_v39 = vadd.f32 1.0, %v2606_v29 }
 0x43b   : > { %v1475_v41 = vadd.f32 1.0, %v2608_v33  ;;  %v2610_v42 = vpop.eup %2609 }
 0x43c   : > { %2613 = vrcp.f32 %v1469_v39  ;;  %v2612_v47 = vpop.eup %2611  ;;  %v1482_v10 = vadd.f32 1.0, %v2610_v42 }
 0x43d   : > { %2615 = vrcp.f32 %v1475_v41 }
 0x43e   : > { %2617 = vrcp.f32 %v1482_v10 }
 0x446   : > { %v2614_v55 = vpop.eup %2613 }
 0x447   : > { %v2616_v59 = vpop.eup %2615  ;;  %v1486_v63 = vmul.f32 %v2614_v55, %v2612_v47 }
 0x448   : > { %v1485_v11 = vmul.f32 %v2616_v59, %v3872_v38  ;;  %v2618_v22 = vpop.eup %2617 }
 0x44a   : > { %v1487_v12 = vadd.f32 %v1486_v63, %v1485_v11 }
 0x44c   : > { %2619 = vtanh.f32 %v1487_v12  ;;  %v1495_v18 = vsel %vm1493_vm2, %v1487_v12, %v3872_v38 }
 0x456   : > { %v2620_v23 = vpop.eup %2619 }
 0x457   : > { %v1489_v36 = vmul.f32 %v2620_v23, %v2618_v22 }
 0x459   : > { %v1494_v61 = vsel %vm1493_vm2, %v1489_v36, %v3878_v3 }
 0x45a   : > { %1497 = vst [vmem:[%s1496_s17] sm:$0xff] %v1494_v61  ;;  %1574 = vmatmul.mubr.f32.vlgmr.msra.gmra.mrb[14].mxu0 %v1494_v61  ;;  %1645 = vmatmul.mubr.f32.vlgmr.msra.gmra.mrb[14].mxu1 %v1494_v61 }
 0x52d   : > { %v1575_v44 = vpop.f32.mrb[14].mxu0  ;;  %v1646_v7 = vpop.f32.mrb[14].mxu1 }
 0x52e   : > { %v1651_v40 = vadd.f32 %v1575_v44, %v1505_v4  ;;  %v1653_v43 = vadd.f32 %v1646_v7, %v1507_v5  ;;  %v1577_v13 = vpop.f32.mrb[15].mxu0  ;;  %v1648_v19 = vpop.f32.mrb[15].mxu1 }
 0x52f   : > { %v1652_v21 = vadd.f32 %v1577_v13, %v1506_v8  ;;  %v1654_v25 = vadd.f32 %v1648_v19, %v1508_v17 }
 0x530   : > { %v2067_v30 = vmul.f32 -1.442695, %v1651_v40 }
 0x531   : > { %v2068_v31 = vmul.f32 -1.442695, %v1652_v21  ;;  %v2069_v32 = vmul.f32 -1.442695, %v1654_v25 }
 0x532   : > { %2621 = vpow2.f32 %v2067_v30 }
 0x533   : > { %2623 = vpow2.f32 %v2068_v31 }
 0x534   : > { %2625 = vpow2.f32 %v2069_v32 }
 0x535   : > { %2627 = vtanh.f32 %v1653_v43 }
 0x53c   : > { %v2622_v34 = vpop.eup %2621 }
 0x53d   : > { %v2624_v35 = vpop.eup %2623  ;;  %v1658_v45 = vadd.f32 1.0, %v2622_v34 }
 0x53e   : > { %v1664_v46 = vadd.f32 1.0, %v2624_v35  ;;  %v2626_v48 = vpop.eup %2625 }
 0x53f   : > { %2629 = vrcp.f32 %v1658_v45  ;;  %v2628_v49 = vpop.eup %2627  ;;  %v1671_v38 = vadd.f32 1.0, %v2626_v48 }
 0x540   : > { %2631 = vrcp.f32 %v1664_v46 }
 0x541   : > { %2633 = vrcp.f32 %v1671_v38 }
 0x549   : > { %v2630_v50 = vpop.eup %2629 }
 0x54a   : > { %v2632_v54 = vpop.eup %2631  ;;  %v1675_v37 = vmul.f32 %v2630_v50, %v2628_v49 }
 0x54b   : > { %v1674_v60 = vmul.f32 %v2632_v54, %v1495_v18  ;;  %v2634_v3 = vpop.eup %2633 }
 0x54d   : > { %v1676_v24 = vadd.f32 %v1675_v37, %v1674_v60 }
 0x54f   : > { %2635 = vtanh.f32 %v1676_v24  ;;  %v1684_v62 = vsel %vm1682_vm3, %v1676_v24, %v1495_v18 }
 0x550   : > { %1688 = vst [vmem:[#allocation3] sm:$0xff] %v1684_v62  ;;  %1694 = vst [vmem:[%s4148_s3] sm:$0xff] (!%p2070_p9), %v1684_v62 }
 0x557   : > { %1692 = sbr.rel (%p2070_p9) target bundleno = 1375 (0x55f), region = 72 }
 0x559   : > { %v2636_v9 = vpop.eup %2635 }
 0x55a   : > { %v1678_v51 = vmul.f32 %v2636_v9, %v2634_v3 }
 0x55c   : > { %v1683_v52 = vsel %vm1682_vm3, %v1678_v51, %v1494_v61 }
 0x55d   : > { %1686 = vst [vmem:[%s1685_s9] sm:$0xff] %v1683_v52  ;;  %1687 = vst [vmem:[#allocation2] sm:$0xff] %v1683_v52 }
 0x55e   : > { %1693 = vst [vmem:[%s540_s28] sm:$0xff] %v1683_v52 }
 0x55f PF: > { %s4228_s1 = sld [smem:[#allocation29_spill]]  ;;  %s4229_s4 = sld [smem:[#allocation32_spill]] }
 0x560   : > { %s4230_s2 = sld [smem:[#allocation49_spill]]  ;;  %s1742_s14 = sshll.u32 %s540_s28, 4  ;;  %s1743_s14 = int_to_ptr.vmem [resolvable:$true] %s1742_s14 }
 0x561   : > { %s4152_s29 = scalar_lea.sflag [#allocation18], %s3478_s7  ;;  %s2797_s16 = scalar_lea.vmem %s1743_s14, 128 }
 0x562   : > { %p2798_p2 = scmp.ne.s32.totalorder %s1743_s14, %s2797_s16  ;;  %s3026_s6 = smov [#allocation17]  }
 0x563   : > { %s2801_s9 = sshll.u32 %s3026_s6, 4  ;;  %s2802_s9 = int_to_ptr.vmem [resolvable:$false] %s2801_s9 }
 0x564   : > { %s2803_s3 = scalar_lea.vmem %s2802_s9, 256  ;;  %p2804_p13 = scmp.lt.s32.totalorder %s1743_s14, %s2802_s9 }
 0x565   : > { %s4149_s17 = sshll.u32 %s4228_s1, 7  ;;  %p4231_p4 = scmp.ne.s32.totalorder %s4229_s4, 0 }
 0x566   : > { %s3955_s8 = scalar_lea.hbm %s4230_s2, %s4149_s17  ;;  %p2805_p10 = scmp.lt.s32.totalorder %s2803_s3, %s2797_s16 }
 0x567   : > { %p2799_p3 = pnand %p2798_p2, %p4231_p4 }
 0x568   : > { %p2806_p12 = por %p2805_p10, %p2804_p13 }
 0x569   : > { %p2800_p6 = pneg %p2799_p3 }
 0x56b   : > { %p2807_p5 = pnand %p2806_p12, %p2800_p6 }
 0x56d   : > { %2810 = shalt.err (!%p2807_p5)
}
 0x56e   : > { %s2811_s28 = scalar_lea.hbm %s3955_s8, 128  ;;  %s2815_s6 = scalar_lea.hbm %s4230_s2, 256 }
 0x56f   : > { %p2812_p0 = scmp.ne.s32.totalorder %s3955_s8, %s2811_s28  ;;  %p2816_p1 = scmp.lt.u32.totalorder %s3955_s8, %s4230_s2 }
 0x570   : > { %p2817_p8 = scmp.lt.u32.totalorder %s2815_s6, %s2811_s28  ;;  %p2819_p2 = scmp.lt.u32.totalorder %s2811_s28, %s3955_s8 }
 0x571   : > { %p2813_p11 = pnand %p2812_p0, %p4231_p4 }
 0x572   : > { %p2818_p9 = por %p2817_p8, %p2816_p1 }
 0x573   : > { %p2814_p7 = pneg %p2813_p11 }
 0x574   : > { %p2820_p3 = por %p2819_p2, %p2818_p9 }
 0x576   : > { %p2821_p6 = pnand %p2820_p3, %p2814_p7 }
 0x578   : > { %2824 = shalt.err (!%p2821_p6)
}
 0x579   : > { %2420 = dma.vmem_to_hbm [thread:$0]  (%p4231_p4), %s1743_s14, 128, %s3955_s8, %s4152_s29  }
 0x57a   : > { %s2075_s3 = sshll.u32 %s4228_s1, 3  ;;  %s1726_s17 = sshll.u32 %s3508_s5, 4  ;;  %s3982_s17 = int_to_ptr.vmem [resolvable:$true] %s1726_s17 }
 0x57b   : > { %s1723_s16 = sadd.s32 %s2075_s3, %s3810_s26  ;;  %s4232_s6 = sld [smem:[#allocation48_spill]] }
 0x57c   : > { %s2076_s28 = sshll.u32 %s1723_s16, 7  ;;  %s3991_s2 = scalar_lea.sflag [#allocation9], %s531_s24 }
 0x57d   : > { %s2825_s15 = scalar_lea.vmem %s3982_s17, 512  ;;  %p4233_p10 = scmp.ne.s32.totalorder %s4203_s12, 0 }
 0x57e   : > { %p2826_p13 = scmp.ne.s32.totalorder %s3982_s17, %s2825_s15  ;;  %s3027_s5 = smov [#allocation16]  }
 0x57f   : > { %s2829_s26 = sshll.u32 %s3027_s5, 4  ;;  %s2830_s26 = int_to_ptr.vmem [resolvable:$false] %s2829_s26 }
 0x580   : > { %p2827_p12 = pnand %p2826_p13, %p4233_p10  ;;  %s2831_s8 = scalar_lea.vmem %s2830_s26, 1024 }
 0x581   : > { %s3987_s9 = scalar_lea.hbm %s4232_s6, %s2076_s28  ;;  %p2832_p0 = scmp.lt.s32.totalorder %s3982_s17, %s2830_s26 }
 0x582   : > { %p2828_p5 = pneg %p2827_p12  ;;  %p2833_p11 = scmp.lt.s32.totalorder %s2831_s8, %s2825_s15 }
 0x584   : > { %p2834_p7 = por %p2833_p11, %p2832_p0 }
 0x586   : > { %p2835_p1 = pnand %p2834_p7, %p2828_p5 }
 0x588   : > { %2838 = shalt.err (!%p2835_p1)
}
 0x589   : > { %s2839_s24 = scalar_lea.hbm %s3987_s9, 512  ;;  %s2843_s16 = scalar_lea.hbm %s4232_s6, 2048 }
 0x58a   : > { %p2840_p8 = scmp.ne.s32.totalorder %s3987_s9, %s2839_s24  ;;  %p2844_p3 = scmp.lt.u32.totalorder %s3987_s9, %s4232_s6 }
 0x58b   : > { %p2845_p6 = scmp.lt.u32.totalorder %s2843_s16, %s2839_s24  ;;  %p2847_p12 = scmp.lt.u32.totalorder %s2839_s24, %s3987_s9 }
 0x58c   : > { %p2841_p9 = pnand %p2840_p8, %p4233_p10 }
 0x58d   : > { %p2846_p13 = por %p2845_p6, %p2844_p3 }
 0x58e   : > { %p2842_p2 = pneg %p2841_p9 }
 0x58f   : > { %p2848_p5 = por %p2847_p12, %p2846_p13 }
 0x591   : > { %p2849_p0 = pnand %p2848_p5, %p2842_p2 }
 0x593   : > { %2852 = shalt.err (!%p2849_p0)
}
 0x594   : > { %s3028_s15 = smov 128   ;;  %s3029_s11 = smov 8  }
 0x595   : > { %2419 = dma.vmem_to_hbm [thread:$0]  (%p4233_p10), %s3982_s17, 512, %s3987_s9, %s3991_s2, %s3028_s15, %s3028_s15, %s3029_s11  }
 0x596   : > { %s4234_s5 = sshll.u32 %s4228_s1, 7  ;;  %s4235_s14 = sld [smem:[#allocation50_spill]] }
 0x597   : > { %s4236_s24 = scalar_lea.vmem [#allocation19], %s3497_s0  ;;  %s3030_s19 = smov [#allocation19]  }
 0x598   : > { %s1755_s16 = sshll.u32 %s4236_s24, 4  ;;  %s2857_s29 = sshll.u32 %s3030_s19, 4  ;;  %s1756_s16 = int_to_ptr.vmem [resolvable:$true] %s1755_s16  ;;  %s2858_s29 = int_to_ptr.vmem [resolvable:$false] %s2857_s29 }
 0x599   : > { %s2853_s28 = scalar_lea.vmem %s1756_s16, 128  ;;  %s2859_s6 = scalar_lea.vmem %s2858_s29, 256 }
 0x59a   : > { %p2854_p11 = scmp.ne.s32.totalorder %s1756_s16, %s2853_s28  ;;  %p2860_p8 = scmp.lt.s32.totalorder %s1756_s16, %s2858_s29 }
 0x59b   : > { %p2861_p10 = scmp.lt.s32.totalorder %s2859_s6, %s2853_s28 }
 0x59c   : > { %s4020_s3 = scalar_lea.hbm %s4235_s14, %s4234_s5  ;;  %p2855_p7 = pnand %p2854_p11, %p4231_p4 }
 0x59d   : > { %p2862_p9 = por %p2861_p10, %p2860_p8 }
 0x59e   : > { %p2856_p1 = pneg %p2855_p7 }
 0x5a0   : > { %p2863_p2 = pnand %p2862_p9, %p2856_p1 }
 0x5a2   : > { %2866 = shalt.err (!%p2863_p2)
}
 0x5a3   : > { %s2867_s12 = scalar_lea.hbm %s4020_s3, 128  ;;  %s2871_s2 = scalar_lea.hbm %s4235_s14, 256 }
 0x5a4   : > { %p2868_p3 = scmp.ne.s32.totalorder %s4020_s3, %s2867_s12  ;;  %p2872_p12 = scmp.lt.u32.totalorder %s4020_s3, %s4235_s14 }
 0x5a5   : > { %p2873_p5 = scmp.lt.u32.totalorder %s2871_s2, %s2867_s12  ;;  %p2875_p11 = scmp.lt.u32.totalorder %s2867_s12, %s4020_s3 }
 0x5a6   : > { %p2869_p6 = pnand %p2868_p3, %p4231_p4 }
 0x5a7   : > { %p2874_p0 = por %p2873_p5, %p2872_p12 }
 0x5a8   : > { %p2870_p13 = pneg %p2869_p6 }
 0x5a9   : > { %p2876_p7 = por %p2875_p11, %p2874_p0 }
 0x5ab   : > { %p2877_p1 = pnand %p2876_p7, %p2870_p13 }
 0x5ad   : > { %2880 = shalt.err (!%p2877_p1)
}
 0x5ae   : > { %s4237_s6 = scalar_lea.sflag [#allocation18], %s3478_s7 }
 0x5af   : > { %2421 = dma.vmem_to_hbm [thread:$0]  (%p4231_p4), %s1756_s16, 128, %s4020_s3, %s4237_s6  }
 0x5b0 PF: > { %s4238_s9 = sld [smem:[#allocation26_spill]]  ;;  %p2452_p8 = scmp.ge.s32.totalorder %s3013_s10, 2 }
 0x5b1   : > { %p4239_p10 = scmp.ne.s32.totalorder %s4205_s27, 0 }
 0x5b3   : > { %p2442_p9 = pnand %p2452_p8, %p4239_p10 }
 0x5b6   : > { %s1767_s15 = sand.u32 1, %s4238_s9  }
 0x5b7   : > { %s1768_s11 = scalar_lea.sflag [#allocation9], %s1767_s15 }
 0x5b8   : > { %2952 = dma.done.wait (!%p2442_p9), %s1768_s11, 512  }
 0x5b9   : > { %2954 = vsyncadd (!%p2442_p9), %s1768_s11, 4294966784  ;;  %s4240_s5 = sadd.s32 4294967294, %s3013_s10   ;;  %s4241_s26 = sld [smem:[#allocation33_spill]] }
 0x5ba   : > { %s1776_s8 = sand.u32 1, %s4240_s5  }
 0x5bb   : > { %s1777_s7 = scalar_lea.sflag [#allocation18], %s1776_s8 }
 0x5bf   : > { %p4242_p2 = scmp.ne.s32.totalorder %s4241_s26, 0 }
 0x5c1   : > { %p2445_p3 = pnand %p2452_p8, %p4242_p2 }
 0x5c3   : > { %2956 = dma.done.wait (!%p2445_p3), %s1777_s7, 256  }
 0x5c4   : > { %2958 = vsyncadd (!%p2445_p3), %s1777_s7, 4294967040  ;;  %s39_s10 = sadd.s32 1, %s3013_s10   ;;  %s4244_s27 = sld [smem:[#allocation40_spill]] }
 0x5c5   : > { %p4052_p4 = scmp.ge.s32.totalorder %s39_s10, 6   ;;  %s4245_s3 = sld [smem:[#allocation27_spill]] }
 0x5c6   : > { %s4246_s26 = sld [smem:[#allocation41_spill]]  ;;  %s4247_s16 = sld [smem:[#allocation30_spill]] }
 0x5c7   : > { %s4248_s29 = sld [smem:[#allocation38_spill]]  ;;  %s4249_s12 = sld [smem:[#allocation39_spill]] }
 0x5c8   : > { %s4250_s19 = smov %s2965_s20  ;;  %s4251_s20 = smov %s2969_s21 }
 0x5c9   : > { %s4252_s21 = smov %s3366_s13  ;;  %s4253_s0 = smov %s2977_s22 }
 0x5ca   : > { %s4254_s22 = smov %s2981_s23  ;;  %s4255_s23 = smov %s4244_s27 }
 0x5cb   : > { %s4256_s24 = smov %s2989_s25  ;;  %s4257_s25 = smov %s4245_s3 }
 0x5cc   : > { %s4258_s27 = smov %s4247_s16  ;;  %s4259_s28 = smov %s3009_s30 }
 0x5cd   : > { %s4260_s30 = smov %s4249_s12  ;;  %38 = sbr.rel (!%p4052_p4) target bundleno = 32 (0x20), region = 188 }
 0x5d4   :  { %1791 = vsyncpa [#allocation8], 1 }
 0x5d5   :  { %1793 = vsyncpa [#allocation8 + $0x1], 1 }
 0x5d6   :  { %1794 = vsyncpa [#allocation11], 1 }
 0x5d7   :  { %1796 = vsyncpa [#allocation11 + $0x1], 1 }
 0x5d8   :  { %1797 = vsyncpa [#allocation14], 1 }
 0x5d9   :  { %1799 = vsyncpa [#allocation14 + $0x1], 1 }
 0x5da   :  { %1800 = vsyncpa [#allocation9], 1 }
 0x5db   :  { %1802 = vsyncpa [#allocation9 + $0x1], 1 }
 0x5dc   :  { %1803 = vsyncpa [#allocation18], 1 }
 0x5dd   :  { %1805 = vsyncpa [#allocation18 + $0x1], 1 }

</bundles_post_ra>
